<compile_context>
chip_gen: v6e
topology: v6e:2x2x1
jax: 0.10.0
libtpu: 0.0.40
codegen_flags: <defaults>
</compile_context>

<pallas_src>
import jax
import jax.numpy as jnp
from jax.experimental import pallas as pl
from jax.experimental.pallas import tpu as pltpu

# ---- static problem configuration (small test shapes) ----
N, CIN, H, W = 2, 3, 16, 16          # input  (N, CIN, H, W)
COUT, KH, KW = 2, 2, 2               # Conv2d(3, 2, kernel_size=2)
PAD, STRIDE = 2, 1
HP, WP = H + 2 * PAD, W + 2 * PAD    # padded spatial (20, 20)
OH = (HP - KH) // STRIDE + 1         # 19
OW = (WP - KW) // STRIDE + 1         # 19
NC = N * CIN                         # flattened (batch, in-channel) planes


def conv_sigmoid_kernel(w_ref, b_ref, x_ref, v1_ref, vt_ref, xc_ref):
    """Single grid-less invocation processing the whole batch.

    w_ref : SMEM (COUT*CIN*KH*KW,) flattened conv weights
    b_ref : SMEM (COUT,)           bias
    x_ref : VMEM (NC, H, W)        un-padded input, (n, ci) flattened
    v1_ref: VMEM (N, COUT, OH, OW) conv output
    vt_ref: VMEM (N, COUT, OH, OW) sigmoid(conv output)
    xc_ref: VMEM scratch (NC, HP, WP) zero-padded canvas
    """
    # Fused zero-padding: one bulk zero (touches each canvas vreg exactly
    # once -- cheaper in store ops than band-wise masked border stores at this
    # 20x20 geometry) + ONE bulk interior copy covering all N*CIN planes.
    xc_ref[...] = jnp.zeros((NC, HP, WP), dtype=jnp.float32)
    xc_ref[:, PAD:PAD + H, PAD:PAD + W] = x_ref[...]

    # Per-(n, co) f32 accumulators initialised from the bias (~12 vregs total).
    accs = [[jnp.full((OH, OW), b_ref[co], dtype=jnp.float32)
             for co in range(COUT)] for n in range(N)]

    # Tap-accumulate on the VPU.  Each of the KH*KW = 4 shifted windows is
    # read ONCE as a bulk (NC, OH, OW) crop and shared by every output plane.
    for kh in range(KH):
        for kw in range(KW):
            tap = xc_ref[:, kh:kh + OH, kw:kw + OW]      # (NC, OH, OW)
            for n in range(N):
                for co in range(COUT):
                    acc = accs[n][co]
                    for ci in range(CIN):
                        widx = ((co * CIN + ci) * KH + kh) * KW + kw
                        acc = acc + tap[n * CIN + ci] * w_ref[widx]
                    accs[n][co] = acc

    # Coalesced output stores: stack all planes (leading-axis concat only,
    # minor dims untouched) and write v1 / vt each with one full-ref store.
    planes = [accs[n][co].reshape(1, OH, OW)
              for n in range(N) for co in range(COUT)]
    v1 = jnp.concatenate(planes, axis=0).reshape(N, COUT, OH, OW)
    v1_ref[...] = v1
    # sigmoid on the EUP: exp + approximate reciprocal (no VPU divide).
    vt_ref[...] = pl.reciprocal(1.0 + jnp.exp(-v1), approx=True)


@jax.jit
def model_forward(x, weight, bias):
    """x: (N, CIN, H, W) f32, weight: (COUT, CIN, KH, KW) f32, bias: (COUT,)."""
    w_flat = weight.reshape(-1).astype(jnp.float32)
    b = bias.astype(jnp.float32)
    x_flat = x.astype(jnp.float32).reshape(NC, H, W)   # free leading-dim reshape

    v1, vt = pl.pallas_call(
        conv_sigmoid_kernel,
        out_shape=(
            jax.ShapeDtypeStruct((N, COUT, OH, OW), jnp.float32),
            jax.ShapeDtypeStruct((N, COUT, OH, OW), jnp.float32),
        ),
        in_specs=[
            pl.BlockSpec(memory_space=pltpu.MemorySpace.SMEM),   # weights
            pl.BlockSpec(memory_space=pltpu.MemorySpace.SMEM),   # bias
            pl.BlockSpec(memory_space=pltpu.MemorySpace.VMEM),   # x (whole)
        ],
        out_specs=(
            pl.BlockSpec(memory_space=pltpu.MemorySpace.VMEM),
            pl.BlockSpec(memory_space=pltpu.MemorySpace.VMEM),
        ),
        scratch_shapes=[pltpu.VMEM((NC, HP, WP), jnp.float32)],
    )(w_flat, b, x_flat)

    # TODO(synk): torch._C._nn.ctc_loss(v1, vt.cpu()) in the reference is an
    # invalid call (ctc_loss needs (T,N,C) log-probs plus int targets/length
    # tensors); it has no JAX/Pallas equivalent here, so the final `* loss`
    # scaling is omitted and v1 / sigmoid(v1) are returned.
    return v1, vt


if __name__ == "__main__":
    key = jax.random.PRNGKey(0)
    kx, kw_, kb = jax.random.split(key, 3)

    x = jax.random.normal(kx, (N, CIN, H, W), dtype=jnp.float32)
    # deterministic Conv2d-style init (uniform +/- 1/sqrt(fan_in), same range
    # as PyTorch's default)
    fan_in = CIN * KH * KW
    bound = 1.0 / (fan_in ** 0.5)
    weight = jax.random.uniform(kw_, (COUT, CIN, KH, KW),
                                minval=-bound, maxval=bound, dtype=jnp.float32)
    bias = jax.random.uniform(kb, (COUT,), minval=-bound, maxval=bound,
                              dtype=jnp.float32)

    v1, vt = model_forward(x, weight, bias)
    jax.block_until_ready((v1, vt))

    # lightweight correctness check against the lax conv reference
    v1_ref = jax.lax.conv_general_dilated(
        x, weight, window_strides=(STRIDE, STRIDE),
        padding=((PAD, PAD), (PAD, PAD)),
        dimension_numbers=("NCHW", "OIHW", "NCHW")) + bias[None, :, None, None]
    assert jnp.allclose(v1, v1_ref, atol=1e-5), "conv mismatch"
    # vt uses the EUP approximate reciprocal -> slightly loose tolerance
    assert jnp.allclose(vt, jax.nn.sigmoid(v1_ref), atol=1e-2), "sigmoid mismatch"

    print("KERNEL_OK")
</pallas_src>

<mosaic_0001>
module attributes {stable_mosaic.version = 11 : i64} {
  func.func @conv_sigmoid_kernel(%arg0: memref<24xf32, #tpu.memory_space<smem>>, %arg1: memref<2xf32, #tpu.memory_space<smem>>, %arg2: memref<6x16x16xf32, #tpu.memory_space<vmem>>, %arg3: memref<2x2x19x19xf32, #tpu.memory_space<vmem>>, %arg4: memref<2x2x19x19xf32, #tpu.memory_space<vmem>>, %arg5: memref<6x20x20xf32, #tpu.memory_space<vmem>>) attributes {dimension_semantics = [], scalar_prefetch = 0 : i64, scratch_operands = 1 : i64, tpu.core_type = #tpu.core_type<tc>} {
    %cst = arith.constant 0.000000e+00 : f32
    %0 = vector.broadcast %cst : f32 to vector<6x20x20xf32>
    %c0 = arith.constant 0 : index
    %c0_0 = arith.constant 0 : index
    %c0_1 = arith.constant 0 : index
    %1 = vector.load %arg5[%c0, %c0_0, %c0_1] : memref<6x20x20xf32, #tpu.memory_space<vmem>>, vector<6x20x20xf32>
    tpu.vector_store %arg5[%c0, %c0_0, %c0_1], %0 {strides = array<i32>} : memref<6x20x20xf32, #tpu.memory_space<vmem>>, vector<6x20x20xf32>,
    %c0_2 = arith.constant 0 : index
    %c0_3 = arith.constant 0 : index
    %c0_4 = arith.constant 0 : index
    %2 = vector.load %arg2[%c0_2, %c0_3, %c0_4] : memref<6x16x16xf32, #tpu.memory_space<vmem>>, vector<6x16x16xf32>
    %c0_5 = arith.constant 0 : index
    %c2 = arith.constant 2 : index
    %c2_6 = arith.constant 2 : index
    %3 = vector.load %arg5[%c0_5, %c2, %c2_6] : memref<6x20x20xf32, #tpu.memory_space<vmem>>, vector<6x16x16xf32>
    tpu.vector_store %arg5[%c0_5, %c2, %c2_6], %2 {strides = array<i32>} : memref<6x20x20xf32, #tpu.memory_space<vmem>>, vector<6x16x16xf32>,
    %c0_7 = arith.constant 0 : index
    %4 = memref.load %arg1[%c0_7] : memref<2xf32, #tpu.memory_space<smem>>
    %5 = vector.broadcast %4 : f32 to vector<19x19xf32>
    %c1 = arith.constant 1 : index
    %6 = memref.load %arg1[%c1] : memref<2xf32, #tpu.memory_space<smem>>
    %7 = vector.broadcast %6 : f32 to vector<19x19xf32>
    %c0_8 = arith.constant 0 : index
    %8 = memref.load %arg1[%c0_8] : memref<2xf32, #tpu.memory_space<smem>>
    %9 = vector.broadcast %8 : f32 to vector<19x19xf32>
    %c1_9 = arith.constant 1 : index
    %10 = memref.load %arg1[%c1_9] : memref<2xf32, #tpu.memory_space<smem>>
    %11 = vector.broadcast %10 : f32 to vector<19x19xf32>
    %c0_10 = arith.constant 0 : index
    %c0_11 = arith.constant 0 : index
    %c0_12 = arith.constant 0 : index
    %12 = vector.load %arg5[%c0_10, %c0_11, %c0_12] : memref<6x20x20xf32, #tpu.memory_space<vmem>>, vector<6x19x19xf32>
    %13 = vector.extract_strided_slice %12 {offsets = [0, 0, 0], sizes = [1, 19, 19], strides = [1, 1, 1]} : vector<6x19x19xf32> to vector<1x19x19xf32>
    %14 = vector.shape_cast %13 : vector<1x19x19xf32> to vector<19x19xf32>
    %c0_13 = arith.constant 0 : index
    %15 = memref.load %arg0[%c0_13] : memref<24xf32, #tpu.memory_space<smem>>
    %16 = vector.broadcast %15 : f32 to vector<19x19xf32>
    %17 = arith.mulf %14, %16 : vector<19x19xf32>
    %18 = arith.addf %5, %17 : vector<19x19xf32>
    %19 = vector.extract_strided_slice %12 {offsets = [1, 0, 0], sizes = [1, 19, 19], strides = [1, 1, 1]} : vector<6x19x19xf32> to vector<1x19x19xf32>
    %20 = vector.shape_cast %19 : vector<1x19x19xf32> to vector<19x19xf32>
    %c4 = arith.constant 4 : index
    %21 = memref.load %arg0[%c4] : memref<24xf32, #tpu.memory_space<smem>>
    %22 = vector.broadcast %21 : f32 to vector<19x19xf32>
    %23 = arith.mulf %20, %22 : vector<19x19xf32>
    %24 = arith.addf %18, %23 : vector<19x19xf32>
    %25 = vector.extract_strided_slice %12 {offsets = [2, 0, 0], sizes = [1, 19, 19], strides = [1, 1, 1]} : vector<6x19x19xf32> to vector<1x19x19xf32>
    %26 = vector.shape_cast %25 : vector<1x19x19xf32> to vector<19x19xf32>
    %c8 = arith.constant 8 : index
    %27 = memref.load %arg0[%c8] : memref<24xf32, #tpu.memory_space<smem>>
    %28 = vector.broadcast %27 : f32 to vector<19x19xf32>
    %29 = arith.mulf %26, %28 : vector<19x19xf32>
    %30 = arith.addf %24, %29 : vector<19x19xf32>
    %31 = vector.extract_strided_slice %12 {offsets = [0, 0, 0], sizes = [1, 19, 19], strides = [1, 1, 1]} : vector<6x19x19xf32> to vector<1x19x19xf32>
    %32 = vector.shape_cast %31 : vector<1x19x19xf32> to vector<19x19xf32>
    %c12 = arith.constant 12 : index
    %33 = memref.load %arg0[%c12] : memref<24xf32, #tpu.memory_space<smem>>
    %34 = vector.broadcast %33 : f32 to vector<19x19xf32>
    %35 = arith.mulf %32, %34 : vector<19x19xf32>
    %36 = arith.addf %7, %35 : vector<19x19xf32>
    %37 = vector.extract_strided_slice %12 {offsets = [1, 0, 0], sizes = [1, 19, 19], strides = [1, 1, 1]} : vector<6x19x19xf32> to vector<1x19x19xf32>
    %38 = vector.shape_cast %37 : vector<1x19x19xf32> to vector<19x19xf32>
    %c16 = arith.constant 16 : index
    %39 = memref.load %arg0[%c16] : memref<24xf32, #tpu.memory_space<smem>>
    %40 = vector.broadcast %39 : f32 to vector<19x19xf32>
    %41 = arith.mulf %38, %40 : vector<19x19xf32>
    %42 = arith.addf %36, %41 : vector<19x19xf32>
    %43 = vector.extract_strided_slice %12 {offsets = [2, 0, 0], sizes = [1, 19, 19], strides = [1, 1, 1]} : vector<6x19x19xf32> to vector<1x19x19xf32>
    %44 = vector.shape_cast %43 : vector<1x19x19xf32> to vector<19x19xf32>
    %c20 = arith.constant 20 : index
    %45 = memref.load %arg0[%c20] : memref<24xf32, #tpu.memory_space<smem>>
    %46 = vector.broadcast %45 : f32 to vector<19x19xf32>
    %47 = arith.mulf %44, %46 : vector<19x19xf32>
    %48 = arith.addf %42, %47 : vector<19x19xf32>
    %49 = vector.extract_strided_slice %12 {offsets = [3, 0, 0], sizes = [1, 19, 19], strides = [1, 1, 1]} : vector<6x19x19xf32> to vector<1x19x19xf32>
    %50 = vector.shape_cast %49 : vector<1x19x19xf32> to vector<19x19xf32>
    %c0_14 = arith.constant 0 : index
    %51 = memref.load %arg0[%c0_14] : memref<24xf32, #tpu.memory_space<smem>>
    %52 = vector.broadcast %51 : f32 to vector<19x19xf32>
    %53 = arith.mulf %50, %52 : vector<19x19xf32>
    %54 = arith.addf %9, %53 : vector<19x19xf32>
    %55 = vector.extract_strided_slice %12 {offsets = [4, 0, 0], sizes = [1, 19, 19], strides = [1, 1, 1]} : vector<6x19x19xf32> to vector<1x19x19xf32>
    %56 = vector.shape_cast %55 : vector<1x19x19xf32> to vector<19x19xf32>
    %c4_15 = arith.constant 4 : index
    %57 = memref.load %arg0[%c4_15] : memref<24xf32, #tpu.memory_space<smem>>
    %58 = vector.broadcast %57 : f32 to vector<19x19xf32>
    %59 = arith.mulf %56, %58 : vector<19x19xf32>
    %60 = arith.addf %54, %59 : vector<19x19xf32>
    %61 = vector.extract_strided_slice %12 {offsets = [5, 0, 0], sizes = [1, 19, 19], strides = [1, 1, 1]} : vector<6x19x19xf32> to vector<1x19x19xf32>
    %62 = vector.shape_cast %61 : vector<1x19x19xf32> to vector<19x19xf32>
    %c8_16 = arith.constant 8 : index
    %63 = memref.load %arg0[%c8_16] : memref<24xf32, #tpu.memory_space<smem>>
    %64 = vector.broadcast %63 : f32 to vector<19x19xf32>
    %65 = arith.mulf %62, %64 : vector<19x19xf32>
    %66 = arith.addf %60, %65 : vector<19x19xf32>
    %67 = vector.extract_strided_slice %12 {offsets = [3, 0, 0], sizes = [1, 19, 19], strides = [1, 1, 1]} : vector<6x19x19xf32> to vector<1x19x19xf32>
    %68 = vector.shape_cast %67 : vector<1x19x19xf32> to vector<19x19xf32>
    %c12_17 = arith.constant 12 : index
    %69 = memref.load %arg0[%c12_17] : memref<24xf32, #tpu.memory_space<smem>>
    %70 = vector.broadcast %69 : f32 to vector<19x19xf32>
    %71 = arith.mulf %68, %70 : vector<19x19xf32>
    %72 = arith.addf %11, %71 : vector<19x19xf32>
    %73 = vector.extract_strided_slice %12 {offsets = [4, 0, 0], sizes = [1, 19, 19], strides = [1, 1, 1]} : vector<6x19x19xf32> to vector<1x19x19xf32>
    %74 = vector.shape_cast %73 : vector<1x19x19xf32> to vector<19x19xf32>
    %c16_18 = arith.constant 16 : index
    %75 = memref.load %arg0[%c16_18] : memref<24xf32, #tpu.memory_space<smem>>
    %76 = vector.broadcast %75 : f32 to vector<19x19xf32>
    %77 = arith.mulf %74, %76 : vector<19x19xf32>
    %78 = arith.addf %72, %77 : vector<19x19xf32>
    %79 = vector.extract_strided_slice %12 {offsets = [5, 0, 0], sizes = [1, 19, 19], strides = [1, 1, 1]} : vector<6x19x19xf32> to vector<1x19x19xf32>
    %80 = vector.shape_cast %79 : vector<1x19x19xf32> to vector<19x19xf32>
    %c20_19 = arith.constant 20 : index
    %81 = memref.load %arg0[%c20_19] : memref<24xf32, #tpu.memory_space<smem>>
    %82 = vector.broadcast %81 : f32 to vector<19x19xf32>
    %83 = arith.mulf %80, %82 : vector<19x19xf32>
    %84 = arith.addf %78, %83 : vector<19x19xf32>
    %c0_20 = arith.constant 0 : index
    %c0_21 = arith.constant 0 : index
    %c1_22 = arith.constant 1 : index
    %85 = vector.load %arg5[%c0_20, %c0_21, %c1_22] : memref<6x20x20xf32, #tpu.memory_space<vmem>>, vector<6x19x19xf32>
    %86 = vector.extract_strided_slice %85 {offsets = [0, 0, 0], sizes = [1, 19, 19], strides = [1, 1, 1]} : vector<6x19x19xf32> to vector<1x19x19xf32>
    %87 = vector.shape_cast %86 : vector<1x19x19xf32> to vector<19x19xf32>
    %c1_23 = arith.constant 1 : index
    %88 = memref.load %arg0[%c1_23] : memref<24xf32, #tpu.memory_space<smem>>
    %89 = vector.broadcast %88 : f32 to vector<19x19xf32>
    %90 = arith.mulf %87, %89 : vector<19x19xf32>
    %91 = arith.addf %30, %90 : vector<19x19xf32>
    %92 = vector.extract_strided_slice %85 {offsets = [1, 0, 0], sizes = [1, 19, 19], strides = [1, 1, 1]} : vector<6x19x19xf32> to vector<1x19x19xf32>
    %93 = vector.shape_cast %92 : vector<1x19x19xf32> to vector<19x19xf32>
    %c5 = arith.constant 5 : index
    %94 = memref.load %arg0[%c5] : memref<24xf32, #tpu.memory_space<smem>>
    %95 = vector.broadcast %94 : f32 to vector<19x19xf32>
    %96 = arith.mulf %93, %95 : vector<19x19xf32>
    %97 = arith.addf %91, %96 : vector<19x19xf32>
    %98 = vector.extract_strided_slice %85 {offsets = [2, 0, 0], sizes = [1, 19, 19], strides = [1, 1, 1]} : vector<6x19x19xf32> to vector<1x19x19xf32>
    %99 = vector.shape_cast %98 : vector<1x19x19xf32> to vector<19x19xf32>
    %c9 = arith.constant 9 : index
    %100 = memref.load %arg0[%c9] : memref<24xf32, #tpu.memory_space<smem>>
    %101 = vector.broadcast %100 : f32 to vector<19x19xf32>
    %102 = arith.mulf %99, %101 : vector<19x19xf32>
    %103 = arith.addf %97, %102 : vector<19x19xf32>
    %104 = vector.extract_strided_slice %85 {offsets = [0, 0, 0], sizes = [1, 19, 19], strides = [1, 1, 1]} : vector<6x19x19xf32> to vector<1x19x19xf32>
    %105 = vector.shape_cast %104 : vector<1x19x19xf32> to vector<19x19xf32>
    %c13 = arith.constant 13 : index
    %106 = memref.load %arg0[%c13] : memref<24xf32, #tpu.memory_space<smem>>
    %107 = vector.broadcast %106 : f32 to vector<19x19xf32>
    %108 = arith.mulf %105, %107 : vector<19x19xf32>
    %109 = arith.addf %48, %108 : vector<19x19xf32>
    %110 = vector.extract_strided_slice %85 {offsets = [1, 0, 0], sizes = [1, 19, 19], strides = [1, 1, 1]} : vector<6x19x19xf32> to vector<1x19x19xf32>
    %111 = vector.shape_cast %110 : vector<1x19x19xf32> to vector<19x19xf32>
    %c17 = arith.constant 17 : index
    %112 = memref.load %arg0[%c17] : memref<24xf32, #tpu.memory_space<smem>>
    %113 = vector.broadcast %112 : f32 to vector<19x19xf32>
    %114 = arith.mulf %111, %113 : vector<19x19xf32>
    %115 = arith.addf %109, %114 : vector<19x19xf32>
    %116 = vector.extract_strided_slice %85 {offsets = [2, 0, 0], sizes = [1, 19, 19], strides = [1, 1, 1]} : vector<6x19x19xf32> to vector<1x19x19xf32>
    %117 = vector.shape_cast %116 : vector<1x19x19xf32> to vector<19x19xf32>
    %c21 = arith.constant 21 : index
    %118 = memref.load %arg0[%c21] : memref<24xf32, #tpu.memory_space<smem>>
    %119 = vector.broadcast %118 : f32 to vector<19x19xf32>
    %120 = arith.mulf %117, %119 : vector<19x19xf32>
    %121 = arith.addf %115, %120 : vector<19x19xf32>
    %122 = vector.extract_strided_slice %85 {offsets = [3, 0, 0], sizes = [1, 19, 19], strides = [1, 1, 1]} : vector<6x19x19xf32> to vector<1x19x19xf32>
    %123 = vector.shape_cast %122 : vector<1x19x19xf32> to vector<19x19xf32>
    %c1_24 = arith.constant 1 : index
    %124 = memref.load %arg0[%c1_24] : memref<24xf32, #tpu.memory_space<smem>>
    %125 = vector.broadcast %124 : f32 to vector<19x19xf32>
    %126 = arith.mulf %123, %125 : vector<19x19xf32>
    %127 = arith.addf %66, %126 : vector<19x19xf32>
    %128 = vector.extract_strided_slice %85 {offsets = [4, 0, 0], sizes = [1, 19, 19], strides = [1, 1, 1]} : vector<6x19x19xf32> to vector<1x19x19xf32>
    %129 = vector.shape_cast %128 : vector<1x19x19xf32> to vector<19x19xf32>
    %c5_25 = arith.constant 5 : index
    %130 = memref.load %arg0[%c5_25] : memref<24xf32, #tpu.memory_space<smem>>
    %131 = vector.broadcast %130 : f32 to vector<19x19xf32>
    %132 = arith.mulf %129, %131 : vector<19x19xf32>
    %133 = arith.addf %127, %132 : vector<19x19xf32>
    %134 = vector.extract_strided_slice %85 {offsets = [5, 0, 0], sizes = [1, 19, 19], strides = [1, 1, 1]} : vector<6x19x19xf32> to vector<1x19x19xf32>
    %135 = vector.shape_cast %134 : vector<1x19x19xf32> to vector<19x19xf32>
    %c9_26 = arith.constant 9 : index
    %136 = memref.load %arg0[%c9_26] : memref<24xf32, #tpu.memory_space<smem>>
    %137 = vector.broadcast %136 : f32 to vector<19x19xf32>
    %138 = arith.mulf %135, %137 : vector<19x19xf32>
    %139 = arith.addf %133, %138 : vector<19x19xf32>
    %140 = vector.extract_strided_slice %85 {offsets = [3, 0, 0], sizes = [1, 19, 19], strides = [1, 1, 1]} : vector<6x19x19xf32> to vector<1x19x19xf32>
    %141 = vector.shape_cast %140 : vector<1x19x19xf32> to vector<19x19xf32>
    %c13_27 = arith.constant 13 : index
    %142 = memref.load %arg0[%c13_27] : memref<24xf32, #tpu.memory_space<smem>>
    %143 = vector.broadcast %142 : f32 to vector<19x19xf32>
    %144 = arith.mulf %141, %143 : vector<19x19xf32>
    %145 = arith.addf %84, %144 : vector<19x19xf32>
    %146 = vector.extract_strided_slice %85 {offsets = [4, 0, 0], sizes = [1, 19, 19], strides = [1, 1, 1]} : vector<6x19x19xf32> to vector<1x19x19xf32>
    %147 = vector.shape_cast %146 : vector<1x19x19xf32> to vector<19x19xf32>
    %c17_28 = arith.constant 17 : index
    %148 = memref.load %arg0[%c17_28] : memref<24xf32, #tpu.memory_space<smem>>
    %149 = vector.broadcast %148 : f32 to vector<19x19xf32>
    %150 = arith.mulf %147, %149 : vector<19x19xf32>
    %151 = arith.addf %145, %150 : vector<19x19xf32>
    %152 = vector.extract_strided_slice %85 {offsets = [5, 0, 0], sizes = [1, 19, 19], strides = [1, 1, 1]} : vector<6x19x19xf32> to vector<1x19x19xf32>
    %153 = vector.shape_cast %152 : vector<1x19x19xf32> to vector<19x19xf32>
    %c21_29 = arith.constant 21 : index
    %154 = memref.load %arg0[%c21_29] : memref<24xf32, #tpu.memory_space<smem>>
    %155 = vector.broadcast %154 : f32 to vector<19x19xf32>
    %156 = arith.mulf %153, %155 : vector<19x19xf32>
    %157 = arith.addf %151, %156 : vector<19x19xf32>
    %c0_30 = arith.constant 0 : index
    %c1_31 = arith.constant 1 : index
    %c0_32 = arith.constant 0 : index
    %158 = vector.load %arg5[%c0_30, %c1_31, %c0_32] : memref<6x20x20xf32, #tpu.memory_space<vmem>>, vector<6x19x19xf32>
    %159 = vector.extract_strided_slice %158 {offsets = [0, 0, 0], sizes = [1, 19, 19], strides = [1, 1, 1]} : vector<6x19x19xf32> to vector<1x19x19xf32>
    %160 = vector.shape_cast %159 : vector<1x19x19xf32> to vector<19x19xf32>
    %c2_33 = arith.constant 2 : index
    %161 = memref.load %arg0[%c2_33] : memref<24xf32, #tpu.memory_space<smem>>
    %162 = vector.broadcast %161 : f32 to vector<19x19xf32>
    %163 = arith.mulf %160, %162 : vector<19x19xf32>
    %164 = arith.addf %103, %163 : vector<19x19xf32>
    %165 = vector.extract_strided_slice %158 {offsets = [1, 0, 0], sizes = [1, 19, 19], strides = [1, 1, 1]} : vector<6x19x19xf32> to vector<1x19x19xf32>
    %166 = vector.shape_cast %165 : vector<1x19x19xf32> to vector<19x19xf32>
    %c6 = arith.constant 6 : index
    %167 = memref.load %arg0[%c6] : memref<24xf32, #tpu.memory_space<smem>>
    %168 = vector.broadcast %167 : f32 to vector<19x19xf32>
    %169 = arith.mulf %166, %168 : vector<19x19xf32>
    %170 = arith.addf %164, %169 : vector<19x19xf32>
    %171 = vector.extract_strided_slice %158 {offsets = [2, 0, 0], sizes = [1, 19, 19], strides = [1, 1, 1]} : vector<6x19x19xf32> to vector<1x19x19xf32>
    %172 = vector.shape_cast %171 : vector<1x19x19xf32> to vector<19x19xf32>
    %c10 = arith.constant 10 : index
    %173 = memref.load %arg0[%c10] : memref<24xf32, #tpu.memory_space<smem>>
    %174 = vector.broadcast %173 : f32 to vector<19x19xf32>
    %175 = arith.mulf %172, %174 : vector<19x19xf32>
    %176 = arith.addf %170, %175 : vector<19x19xf32>
    %177 = vector.extract_strided_slice %158 {offsets = [0, 0, 0], sizes = [1, 19, 19], strides = [1, 1, 1]} : vector<6x19x19xf32> to vector<1x19x19xf32>
    %178 = vector.shape_cast %177 : vector<1x19x19xf32> to vector<19x19xf32>
    %c14 = arith.constant 14 : index
    %179 = memref.load %arg0[%c14] : memref<24xf32, #tpu.memory_space<smem>>
    %180 = vector.broadcast %179 : f32 to vector<19x19xf32>
    %181 = arith.mulf %178, %180 : vector<19x19xf32>
    %182 = arith.addf %121, %181 : vector<19x19xf32>
    %183 = vector.extract_strided_slice %158 {offsets = [1, 0, 0], sizes = [1, 19, 19], strides = [1, 1, 1]} : vector<6x19x19xf32> to vector<1x19x19xf32>
    %184 = vector.shape_cast %183 : vector<1x19x19xf32> to vector<19x19xf32>
    %c18 = arith.constant 18 : index
    %185 = memref.load %arg0[%c18] : memref<24xf32, #tpu.memory_space<smem>>
    %186 = vector.broadcast %185 : f32 to vector<19x19xf32>
    %187 = arith.mulf %184, %186 : vector<19x19xf32>
    %188 = arith.addf %182, %187 : vector<19x19xf32>
    %189 = vector.extract_strided_slice %158 {offsets = [2, 0, 0], sizes = [1, 19, 19], strides = [1, 1, 1]} : vector<6x19x19xf32> to vector<1x19x19xf32>
    %190 = vector.shape_cast %189 : vector<1x19x19xf32> to vector<19x19xf32>
    %c22 = arith.constant 22 : index
    %191 = memref.load %arg0[%c22] : memref<24xf32, #tpu.memory_space<smem>>
    %192 = vector.broadcast %191 : f32 to vector<19x19xf32>
    %193 = arith.mulf %190, %192 : vector<19x19xf32>
    %194 = arith.addf %188, %193 : vector<19x19xf32>
    %195 = vector.extract_strided_slice %158 {offsets = [3, 0, 0], sizes = [1, 19, 19], strides = [1, 1, 1]} : vector<6x19x19xf32> to vector<1x19x19xf32>
    %196 = vector.shape_cast %195 : vector<1x19x19xf32> to vector<19x19xf32>
    %c2_34 = arith.constant 2 : index
    %197 = memref.load %arg0[%c2_34] : memref<24xf32, #tpu.memory_space<smem>>
    %198 = vector.broadcast %197 : f32 to vector<19x19xf32>
    %199 = arith.mulf %196, %198 : vector<19x19xf32>
    %200 = arith.addf %139, %199 : vector<19x19xf32>
    %201 = vector.extract_strided_slice %158 {offsets = [4, 0, 0], sizes = [1, 19, 19], strides = [1, 1, 1]} : vector<6x19x19xf32> to vector<1x19x19xf32>
    %202 = vector.shape_cast %201 : vector<1x19x19xf32> to vector<19x19xf32>
    %c6_35 = arith.constant 6 : index
    %203 = memref.load %arg0[%c6_35] : memref<24xf32, #tpu.memory_space<smem>>
    %204 = vector.broadcast %203 : f32 to vector<19x19xf32>
    %205 = arith.mulf %202, %204 : vector<19x19xf32>
    %206 = arith.addf %200, %205 : vector<19x19xf32>
    %207 = vector.extract_strided_slice %158 {offsets = [5, 0, 0], sizes = [1, 19, 19], strides = [1, 1, 1]} : vector<6x19x19xf32> to vector<1x19x19xf32>
    %208 = vector.shape_cast %207 : vector<1x19x19xf32> to vector<19x19xf32>
    %c10_36 = arith.constant 10 : index
    %209 = memref.load %arg0[%c10_36] : memref<24xf32, #tpu.memory_space<smem>>
    %210 = vector.broadcast %209 : f32 to vector<19x19xf32>
    %211 = arith.mulf %208, %210 : vector<19x19xf32>
    %212 = arith.addf %206, %211 : vector<19x19xf32>
    %213 = vector.extract_strided_slice %158 {offsets = [3, 0, 0], sizes = [1, 19, 19], strides = [1, 1, 1]} : vector<6x19x19xf32> to vector<1x19x19xf32>
    %214 = vector.shape_cast %213 : vector<1x19x19xf32> to vector<19x19xf32>
    %c14_37 = arith.constant 14 : index
    %215 = memref.load %arg0[%c14_37] : memref<24xf32, #tpu.memory_space<smem>>
    %216 = vector.broadcast %215 : f32 to vector<19x19xf32>
    %217 = arith.mulf %214, %216 : vector<19x19xf32>
    %218 = arith.addf %157, %217 : vector<19x19xf32>
    %219 = vector.extract_strided_slice %158 {offsets = [4, 0, 0], sizes = [1, 19, 19], strides = [1, 1, 1]} : vector<6x19x19xf32> to vector<1x19x19xf32>
    %220 = vector.shape_cast %219 : vector<1x19x19xf32> to vector<19x19xf32>
    %c18_38 = arith.constant 18 : index
    %221 = memref.load %arg0[%c18_38] : memref<24xf32, #tpu.memory_space<smem>>
    %222 = vector.broadcast %221 : f32 to vector<19x19xf32>
    %223 = arith.mulf %220, %222 : vector<19x19xf32>
    %224 = arith.addf %218, %223 : vector<19x19xf32>
    %225 = vector.extract_strided_slice %158 {offsets = [5, 0, 0], sizes = [1, 19, 19], strides = [1, 1, 1]} : vector<6x19x19xf32> to vector<1x19x19xf32>
    %226 = vector.shape_cast %225 : vector<1x19x19xf32> to vector<19x19xf32>
    %c22_39 = arith.constant 22 : index
    %227 = memref.load %arg0[%c22_39] : memref<24xf32, #tpu.memory_space<smem>>
    %228 = vector.broadcast %227 : f32 to vector<19x19xf32>
    %229 = arith.mulf %226, %228 : vector<19x19xf32>
    %230 = arith.addf %224, %229 : vector<19x19xf32>
    %c0_40 = arith.constant 0 : index
    %c1_41 = arith.constant 1 : index
    %c1_42 = arith.constant 1 : index
    %231 = vector.load %arg5[%c0_40, %c1_41, %c1_42] : memref<6x20x20xf32, #tpu.memory_space<vmem>>, vector<6x19x19xf32>
    %232 = vector.extract_strided_slice %231 {offsets = [0, 0, 0], sizes = [1, 19, 19], strides = [1, 1, 1]} : vector<6x19x19xf32> to vector<1x19x19xf32>
    %233 = vector.shape_cast %232 : vector<1x19x19xf32> to vector<19x19xf32>
    %c3 = arith.constant 3 : index
    %234 = memref.load %arg0[%c3] : memref<24xf32, #tpu.memory_space<smem>>
    %235 = vector.broadcast %234 : f32 to vector<19x19xf32>
    %236 = arith.mulf %233, %235 : vector<19x19xf32>
    %237 = arith.addf %176, %236 : vector<19x19xf32>
    %238 = vector.extract_strided_slice %231 {offsets = [1, 0, 0], sizes = [1, 19, 19], strides = [1, 1, 1]} : vector<6x19x19xf32> to vector<1x19x19xf32>
    %239 = vector.shape_cast %238 : vector<1x19x19xf32> to vector<19x19xf32>
    %c7 = arith.constant 7 : index
    %240 = memref.load %arg0[%c7] : memref<24xf32, #tpu.memory_space<smem>>
    %241 = vector.broadcast %240 : f32 to vector<19x19xf32>
    %242 = arith.mulf %239, %241 : vector<19x19xf32>
    %243 = arith.addf %237, %242 : vector<19x19xf32>
    %244 = vector.extract_strided_slice %231 {offsets = [2, 0, 0], sizes = [1, 19, 19], strides = [1, 1, 1]} : vector<6x19x19xf32> to vector<1x19x19xf32>
    %245 = vector.shape_cast %244 : vector<1x19x19xf32> to vector<19x19xf32>
    %c11 = arith.constant 11 : index
    %246 = memref.load %arg0[%c11] : memref<24xf32, #tpu.memory_space<smem>>
    %247 = vector.broadcast %246 : f32 to vector<19x19xf32>
    %248 = arith.mulf %245, %247 : vector<19x19xf32>
    %249 = arith.addf %243, %248 : vector<19x19xf32>
    %250 = vector.extract_strided_slice %231 {offsets = [0, 0, 0], sizes = [1, 19, 19], strides = [1, 1, 1]} : vector<6x19x19xf32> to vector<1x19x19xf32>
    %251 = vector.shape_cast %250 : vector<1x19x19xf32> to vector<19x19xf32>
    %c15 = arith.constant 15 : index
    %252 = memref.load %arg0[%c15] : memref<24xf32, #tpu.memory_space<smem>>
    %253 = vector.broadcast %252 : f32 to vector<19x19xf32>
    %254 = arith.mulf %251, %253 : vector<19x19xf32>
    %255 = arith.addf %194, %254 : vector<19x19xf32>
    %256 = vector.extract_strided_slice %231 {offsets = [1, 0, 0], sizes = [1, 19, 19], strides = [1, 1, 1]} : vector<6x19x19xf32> to vector<1x19x19xf32>
    %257 = vector.shape_cast %256 : vector<1x19x19xf32> to vector<19x19xf32>
    %c19 = arith.constant 19 : index
    %258 = memref.load %arg0[%c19] : memref<24xf32, #tpu.memory_space<smem>>
    %259 = vector.broadcast %258 : f32 to vector<19x19xf32>
    %260 = arith.mulf %257, %259 : vector<19x19xf32>
    %261 = arith.addf %255, %260 : vector<19x19xf32>
    %262 = vector.extract_strided_slice %231 {offsets = [2, 0, 0], sizes = [1, 19, 19], strides = [1, 1, 1]} : vector<6x19x19xf32> to vector<1x19x19xf32>
    %263 = vector.shape_cast %262 : vector<1x19x19xf32> to vector<19x19xf32>
    %c23 = arith.constant 23 : index
    %264 = memref.load %arg0[%c23] : memref<24xf32, #tpu.memory_space<smem>>
    %265 = vector.broadcast %264 : f32 to vector<19x19xf32>
    %266 = arith.mulf %263, %265 : vector<19x19xf32>
    %267 = arith.addf %261, %266 : vector<19x19xf32>
    %268 = vector.extract_strided_slice %231 {offsets = [3, 0, 0], sizes = [1, 19, 19], strides = [1, 1, 1]} : vector<6x19x19xf32> to vector<1x19x19xf32>
    %269 = vector.shape_cast %268 : vector<1x19x19xf32> to vector<19x19xf32>
    %c3_43 = arith.constant 3 : index
    %270 = memref.load %arg0[%c3_43] : memref<24xf32, #tpu.memory_space<smem>>
    %271 = vector.broadcast %270 : f32 to vector<19x19xf32>
    %272 = arith.mulf %269, %271 : vector<19x19xf32>
    %273 = arith.addf %212, %272 : vector<19x19xf32>
    %274 = vector.extract_strided_slice %231 {offsets = [4, 0, 0], sizes = [1, 19, 19], strides = [1, 1, 1]} : vector<6x19x19xf32> to vector<1x19x19xf32>
    %275 = vector.shape_cast %274 : vector<1x19x19xf32> to vector<19x19xf32>
    %c7_44 = arith.constant 7 : index
    %276 = memref.load %arg0[%c7_44] : memref<24xf32, #tpu.memory_space<smem>>
    %277 = vector.broadcast %276 : f32 to vector<19x19xf32>
    %278 = arith.mulf %275, %277 : vector<19x19xf32>
    %279 = arith.addf %273, %278 : vector<19x19xf32>
    %280 = vector.extract_strided_slice %231 {offsets = [5, 0, 0], sizes = [1, 19, 19], strides = [1, 1, 1]} : vector<6x19x19xf32> to vector<1x19x19xf32>
    %281 = vector.shape_cast %280 : vector<1x19x19xf32> to vector<19x19xf32>
    %c11_45 = arith.constant 11 : index
    %282 = memref.load %arg0[%c11_45] : memref<24xf32, #tpu.memory_space<smem>>
    %283 = vector.broadcast %282 : f32 to vector<19x19xf32>
    %284 = arith.mulf %281, %283 : vector<19x19xf32>
    %285 = arith.addf %279, %284 : vector<19x19xf32>
    %286 = vector.extract_strided_slice %231 {offsets = [3, 0, 0], sizes = [1, 19, 19], strides = [1, 1, 1]} : vector<6x19x19xf32> to vector<1x19x19xf32>
    %287 = vector.shape_cast %286 : vector<1x19x19xf32> to vector<19x19xf32>
    %c15_46 = arith.constant 15 : index
    %288 = memref.load %arg0[%c15_46] : memref<24xf32, #tpu.memory_space<smem>>
    %289 = vector.broadcast %288 : f32 to vector<19x19xf32>
    %290 = arith.mulf %287, %289 : vector<19x19xf32>
    %291 = arith.addf %230, %290 : vector<19x19xf32>
    %292 = vector.extract_strided_slice %231 {offsets = [4, 0, 0], sizes = [1, 19, 19], strides = [1, 1, 1]} : vector<6x19x19xf32> to vector<1x19x19xf32>
    %293 = vector.shape_cast %292 : vector<1x19x19xf32> to vector<19x19xf32>
    %c19_47 = arith.constant 19 : index
    %294 = memref.load %arg0[%c19_47] : memref<24xf32, #tpu.memory_space<smem>>
    %295 = vector.broadcast %294 : f32 to vector<19x19xf32>
    %296 = arith.mulf %293, %295 : vector<19x19xf32>
    %297 = arith.addf %291, %296 : vector<19x19xf32>
    %298 = vector.extract_strided_slice %231 {offsets = [5, 0, 0], sizes = [1, 19, 19], strides = [1, 1, 1]} : vector<6x19x19xf32> to vector<1x19x19xf32>
    %299 = vector.shape_cast %298 : vector<1x19x19xf32> to vector<19x19xf32>
    %c23_48 = arith.constant 23 : index
    %300 = memref.load %arg0[%c23_48] : memref<24xf32, #tpu.memory_space<smem>>
    %301 = vector.broadcast %300 : f32 to vector<19x19xf32>
    %302 = arith.mulf %299, %301 : vector<19x19xf32>
    %303 = arith.addf %297, %302 : vector<19x19xf32>
    %304 = vector.shape_cast %249 : vector<19x19xf32> to vector<1x19x19xf32>
    %305 = vector.shape_cast %267 : vector<19x19xf32> to vector<1x19x19xf32>
    %306 = vector.shape_cast %285 : vector<19x19xf32> to vector<1x19x19xf32>
    %307 = vector.shape_cast %303 : vector<19x19xf32> to vector<1x19x19xf32>
    %308 = tpu.concatenate %304, %305, %306, %307 in 0 : vector<1x19x19xf32>, vector<1x19x19xf32>, vector<1x19x19xf32>, vector<1x19x19xf32> -> vector<4x19x19xf32>
    %309 = vector.shape_cast %308 : vector<4x19x19xf32> to vector<2x2x19x19xf32>
    %c0_49 = arith.constant 0 : index
    %c0_50 = arith.constant 0 : index
    %c0_51 = arith.constant 0 : index
    %c0_52 = arith.constant 0 : index
    %310 = vector.load %arg3[%c0_49, %c0_50, %c0_51, %c0_52] : memref<2x2x19x19xf32, #tpu.memory_space<vmem>>, vector<2x2x19x19xf32>
    tpu.vector_store %arg3[%c0_49, %c0_50, %c0_51, %c0_52], %309 {strides = array<i32>} : memref<2x2x19x19xf32, #tpu.memory_space<vmem>>, vector<2x2x19x19xf32>,
    %cst_53 = arith.constant 0.000000e+00 : f32
    %311 = vector.broadcast %cst_53 : f32 to vector<2x2x19x19xf32>
    %312 = arith.subf %311, %309 : vector<2x2x19x19xf32>
    %313 = math.exp %312 : vector<2x2x19x19xf32>
    %cst_54 = arith.constant 1.000000e+00 : f32
    %314 = vector.broadcast %cst_54 : f32 to vector<2x2x19x19xf32>
    %315 = arith.addf %314, %313 : vector<2x2x19x19xf32>
    %316 = tpu.reciprocal %315 {approx = true} : vector<2x2x19x19xf32> -> vector<2x2x19x19xf32>
    %c0_55 = arith.constant 0 : index
    %c0_56 = arith.constant 0 : index
    %c0_57 = arith.constant 0 : index
    %c0_58 = arith.constant 0 : index
    %317 = vector.load %arg4[%c0_55, %c0_56, %c0_57, %c0_58] : memref<2x2x19x19xf32, #tpu.memory_space<vmem>>, vector<2x2x19x19xf32>
    tpu.vector_store %arg4[%c0_55, %c0_56, %c0_57, %c0_58], %316 {strides = array<i32>} : memref<2x2x19x19xf32, #tpu.memory_space<vmem>>, vector<2x2x19x19xf32>,
    return
  }
}

</mosaic_0001>

<bundles_post_ra>
// kernel: model_forward.1
= control target key start
LH: loop header
LB: loop body
LE: loop exit
PB: predicated region body
PF: predicated region fallthrough
CT: control target
= control target key end

     0   :  { %10 = vsyncpa [#allocation5], 0  ;;  %s1779_s0 = inlined_call_operand.vmem [shape: f32[24], index: 0, kind: input, shape index: {}]   ;;  %s1780_s1 = inlined_call_operand.vmem [shape: f32[2], index: 1, kind: input, shape index: {}]   ;;  %s1781_s2 = inlined_call_operand.hbm [shape: f32[6,16,16], index: 2, kind: input, shape index: {}]   ;;  %s1782_s3 = inlined_call_operand.vmem [shape: f32[2,2,19,19], index: 3, kind: output, shape index: {0}]   ;;  %s1783_s4 = inlined_call_operand.vmem [shape: f32[2,2,19,19], index: 4, kind: output, shape index: {1}]  }
   0x1   :  { %11 = vsyncpa [#allocation7], 0  ;;  %s19_s17 = sshll.u32 %s1779_s0, 4  ;;  %s20_s17 = int_to_ptr.vmem [resolvable:$true] %s19_s17 }
   0x2   :  { %12 = vsyncpa [#allocation4], 0  ;;  %s29_s20 = sshll.u32 %s1780_s1, 4  ;;  %s989_s21 = scalar_lea.vmem %s20_s17, 16  ;;  %s30_s20 = int_to_ptr.vmem [resolvable:$true] %s29_s20 }
   0x3   :  { %p990_p0 = scmp.ne.s32.totalorder %s20_s17, %s989_s21  ;;  %p994_p1 = scmp.lt.s32.totalorder %s20_s17, %s20_s17 }
   0x4   :  { %p995_p2 = scmp.lt.s32.totalorder %s989_s21, %s989_s21 }
   0x6   :  { %p996_p3 = por %p995_p2, %p994_p1 }
   0x8   :  { %p997_p4 = pnand %p996_p3, %p990_p0 }
   0xa   :  { %1000 = shalt.err (!%p997_p4)
}
   0xb   :  { %s1039_s22 = smov [#allocation3]   ;;  %s1001_s23 = scalar_lea.vmem %s30_s20, 16 }
   0xc   :  { %22 = dma.vmem_to_smem %s20_s17, 16, %s1039_s22, [#allocation5]  }
   0xd   :  { %p1002_p5 = scmp.ne.s32.totalorder %s30_s20, %s1001_s23  ;;  %p1006_p6 = scmp.lt.s32.totalorder %s30_s20, %s30_s20 }
   0xe   :  { %p1007_p7 = scmp.lt.s32.totalorder %s1001_s23, %s1001_s23 }
  0x10   :  { %p1008_p8 = por %p1007_p7, %p1006_p6 }
  0x12   :  { %p1009_p9 = pnand %p1008_p8, %p1002_p5 }
  0x14   :  { %1012 = shalt.err (!%p1009_p9)
}
  0x15   :  { %s1040_s0 = smov [#allocation6]   ;;  %s1041_s1 = smov [#allocation8]  }
  0x16   :  { %32 = dma.vmem_to_smem %s30_s20, 16, %s1040_s0, [#allocation7]  }
  0x17   :  { %s38_s24 = sshll.u32 %s1041_s1, 4  ;;  %s39_s24 = int_to_ptr.vmem [resolvable:$true] %s38_s24 }
  0x18   :  { %s1021_s25 = scalar_lea.vmem %s39_s24, 1536  ;;  %p1026_p11 = scmp.lt.s32.totalorder %s39_s24, %s39_s24 }
  0x19   :  { %p1022_p10 = scmp.ne.s32.totalorder %s39_s24, %s1021_s25  ;;  %p1027_p12 = scmp.lt.s32.totalorder %s1021_s25, %s1021_s25 }
  0x1b   :  { %p1028_p13 = por %p1027_p12, %p1026_p11 }
  0x1d   :  { %p1029_p0 = pnand %p1028_p13, %p1022_p10 }
  0x1f   :  { %1032 = shalt.err (!%p1029_p0)
}
  0x20   :  { %s1042_s26 = smov 128   ;;  %s1043_s27 = smov 8  }
  0x21   :  { %44 = dma.hbm_to_vmem [thread:$0]  %s1781_s2, 1536, %s39_s24, [#allocation4], %s1042_s26, %s1042_s26, %s1043_s27  }
  0x22   :  { %1033 = dma.done.wait [#allocation5], 16  }
  0x23   :  { %1034 = vsyncadd [#allocation5], 4294967280 }
  0x24   :  { %1035 = dma.done.wait [#allocation7], 16  }
  0x25   :  { %1036 = vsyncadd [#allocation7], 4294967280 }
  0x26   :  { %1037 = dma.done.wait [#allocation4], 1536  }
  0x27   :  { %1038 = vsyncadd [#allocation4], 4294965760 }
  0x28   :  { %54 = sfence }
  0x29   :  { %v81_v0 = vld [vmem:[#allocation8 + $0x30] sm:$0xff]  ;;  %v75_v1 = vld [vmem:[#allocation8] sm:$0xff]  ;;  %vm55_vm0 = vcmask 162816   ;;  %s1044_s30 = smov 2   ;;  %vm58_vm1 = vcmask 158720   ;;  %v82_v2 = vld [vmem:[#allocation8 + $0x38] sm:$0xff] }
  0x2a   :  { %111 = vrot.lane.b32.xlu1 %v81_v0, %s1044_s30  ;;  %99 = vrot.lane.b32.xlu0 %v75_v1, %s1044_s30  ;;  %v76_v3 = vld [vmem:[#allocation8 + $0x8] sm:$0xff]  ;;  %v1045_v4 = vmov 0.0   ;;  %v78_v5 = vld [vmem:[#allocation8 + $0x18] sm:$0xff]  ;;  %v77_v6 = vld [vmem:[#allocation8 + $0x10] sm:$0xff]  ;;  %vm135_vm2 = vcmask 146448   ;;  %s915_s2 = sld [smem:[#allocation3 + $0x1]] }
  0x2b   :  { %66 = vst.msk [vmem:[#allocation2 + $0x48] sm:$0xff] %vm55_vm0, %v1045_v4  ;;  %67 = vst.msk [vmem:[#allocation2 + $0x50] sm:$0xff] %vm55_vm0, %v1045_v4  ;;  %v84_v7 = vld [vmem:[#allocation8 + $0x48] sm:$0xff]  ;;  %v83_v8 = vld [vmem:[#allocation8 + $0x40] sm:$0xff]  ;;  %s916_s5 = sld [smem:[#allocation3 + $0x5]]  ;;  %s1046_s9 = smov 127  }
  0x2c   :  { %56 = vst.msk [vmem:[#allocation2] sm:$0xff] %vm55_vm0, %v1045_v4  ;;  %57 = vst.msk [vmem:[#allocation2 + $0x8] sm:$0xff] %vm55_vm0, %v1045_v4  ;;  %v80_v9 = vld [vmem:[#allocation8 + $0x28] sm:$0xff]  ;;  %v79_v10 = vld [vmem:[#allocation8 + $0x20] sm:$0xff]  ;;  %s170_s6 = sld [smem:[#allocation3]]  ;;  %vm812_vm3 = vcmask 154624  }
  0x2d   :  { %60 = vst.msk [vmem:[#allocation2 + $0x18] sm:$0xff] %vm55_vm0, %v1045_v4  ;;  %61 = vst.msk [vmem:[#allocation2 + $0x20] sm:$0xff] %vm55_vm0, %v1045_v4  ;;  %v86_v11 = vld [vmem:[#allocation8 + $0x58] sm:$0xff]  ;;  %v85_v12 = vld [vmem:[#allocation8 + $0x50] sm:$0xff]  ;;  %s910_s7 = sld [smem:[#allocation3 + $0x4]]  ;;  %vm815_vm4 = vcmask 149504  }
  0x2e   :  { %63 = vst.msk [vmem:[#allocation2 + $0x30] sm:$0xff] %vm55_vm0, %v1045_v4  ;;  %64 = vst.msk [vmem:[#allocation2 + $0x38] sm:$0xff] %vm55_vm0, %v1045_v4  ;;  %113 = vrot.lane.b32.xlu1 %v82_v2, %s1044_s30  ;;  %101 = vrot.lane.b32.xlu0 %v76_v3, %s1044_s30  ;;  %s148_s8 = sld [smem:[#allocation6]] }
  0x2f   :  { %69 = vst.msk [vmem:[#allocation2 + $0x60] sm:$0xff] %vm55_vm0, %v1045_v4  ;;  %70 = vst.msk [vmem:[#allocation2 + $0x68] sm:$0xff] %vm55_vm0, %v1045_v4  ;;  %s917_s10 = sld [smem:[#allocation3 + $0x9]] }
  0x30   :  { %72 = vst.msk [vmem:[#allocation2 + $0x78] sm:$0xff] %vm55_vm0, %v1045_v4  ;;  %73 = vst.msk [vmem:[#allocation2 + $0x80] sm:$0xff] %vm55_vm0, %v1045_v4  ;;  %v1115_v17 = vstv %s915_s2  ;;  %s911_s11 = sld [smem:[#allocation3 + $0x8]] }
  0x31   :  { %68 = vst.msk [vmem:[#allocation2 + $0x58] sm:$0xf] %vm58_vm1, %v1045_v4  ;;  %59 = vst.msk [vmem:[#allocation2 + $0x10] sm:$0xf] %vm58_vm1, %v1045_v4  ;;  %v1134_v28 = vstv %s916_s5  ;;  %s918_s12 = sld [smem:[#allocation3 + $0xd]] }
  0x32   :  { %62 = vst.msk [vmem:[#allocation2 + $0x28] sm:$0xf] %vm58_vm1, %v1045_v4  ;;  %65 = vst.msk [vmem:[#allocation2 + $0x40] sm:$0xf] %vm58_vm1, %v1045_v4  ;;  %105 = vrot.lane.b32.xlu1 %v78_v5, %s1044_s30  ;;  %103 = vrot.lane.b32.xlu0 %v77_v6, %s1044_s30  ;;  %v1136_v29 = vstv %s170_s6  ;;  %s912_s13 = sld [smem:[#allocation3 + $0xc]] }
  0x33   :  { %71 = vst.msk [vmem:[#allocation2 + $0x70] sm:$0xf] %vm58_vm1, %v1045_v4  ;;  %74 = vst.msk [vmem:[#allocation2 + $0x88] sm:$0xf] %vm58_vm1, %v1045_v4  ;;  %v1150_v36 = vstv %s910_s7  ;;  %s1162_s14 = sld [smem:[#allocation6 + $0x1]] }
  0x34   :  { %v1156_v39 = vstv %s148_s8  ;;  %s1169_s15 = sld [smem:[#allocation3 + $0x10]] }
  0x35   :  { %v1171_v45 = vstv %s917_s10  ;;  %s1173_s16 = sld [smem:[#allocation3 + $0x14]] }
  0x36   :  { %117 = vrot.lane.b32.xlu1 %v84_v7, %s1044_s30  ;;  %115 = vrot.lane.b32.xlu0 %v83_v8, %s1044_s30  ;;  %s1176_s17 = sld [smem:[#allocation3 + $0x11]]  ;;  %v1178_v46 = vstv %s911_s11 }
  0x37   :  { %v1189_v54 = vstv %s918_s12  ;;  %s1202_s18 = sld [smem:[#allocation3 + $0x15]] }
  0x38   :  { %v1198_v59 = vstv %s912_s13  ;;  %s927_s19 = sld [smem:[#allocation3 + $0x3]] }
  0x39   :  { %v1219_v4 = vstv %s1162_s14  ;;  %s930_s20 = sld [smem:[#allocation3 + $0xf]] }
  0x3a   :  { %109 = vrot.lane.b32.xlu1 %v80_v9, %s1044_s30  ;;  %107 = vrot.lane.b32.xlu0 %v79_v10, %s1044_s30  ;;  %v1224_v8 = vstv %s1169_s15  ;;  %s928_s21 = sld [smem:[#allocation3 + $0x7]] }
  0x3b   :  { %v1227_v9 = vstv %s1173_s16  ;;  %s931_s22 = sld [smem:[#allocation3 + $0x13]] }
  0x3c   :  { %v1232_v10 = vstv %s1176_s17  ;;  %s929_s23 = sld [smem:[#allocation3 + $0xb]] }
  0x3d   :  { %s932_s0 = sld [smem:[#allocation3 + $0x17]] }
  0x3e   :  { %121 = vrot.lane.b32.xlu1 %v86_v11, %s1044_s30  ;;  %119 = vrot.lane.b32.xlu0 %v85_v12, %s1044_s30  ;;  %s921_s1 = sld [smem:[#allocation3 + $0x2]] }
  0x3f   :  { %s922_s24 = sld [smem:[#allocation3 + $0x6]] }
  0x40   :  { %s923_s25 = sld [smem:[#allocation3 + $0xa]] }
  0x41   :  { %s924_s26 = sld [smem:[#allocation3 + $0xe]] }
  0x42   :  { %s925_s27 = sld [smem:[#allocation3 + $0x12]] }
  0x43   :  { %s926_s28 = sld [smem:[#allocation3 + $0x16]] }
  0x9c   :  { %v112_v13 = vpop.permute.xlu1 %111  ;;  %v100_v14 = vpop.permute.xlu0 %99 }
  0x9d   :  { %142 = vst.msk [vmem:[#allocation2 + $0x4a] sm:$0xff] %vm135_vm2, %v112_v13  ;;  %136 = vst.msk [vmem:[#allocation2 + $0x2] sm:$0xff] %vm135_vm2, %v100_v14 }
  0xa0   :  { %v114_v15 = vpop.permute.xlu1 %113  ;;  %v102_v16 = vpop.permute.xlu0 %101 }
  0xa1   :  { %143 = vst.msk [vmem:[#allocation2 + $0x52] sm:$0xff] %vm135_vm2, %v114_v15  ;;  %137 = vst.msk [vmem:[#allocation2 + $0xa] sm:$0xff] %vm135_vm2, %v102_v16 }
  0xa4   :  { %v106_v18 = vpop.permute.xlu1 %105  ;;  %v104_v19 = vpop.permute.xlu0 %103  ;;  %v1117_v20 = vld [vmem:[#allocation2] sm:$0xff]  ;;  %v1216_v3 = vld [vmem:[#allocation2 + $0x48] sm:$0xff] }
  0xa5   :  { %139 = vst.msk [vmem:[#allocation2 + $0x22] sm:$0xff] %vm135_vm2, %v106_v18  ;;  %138 = vst.msk [vmem:[#allocation2 + $0x1a] sm:$0xff] %vm135_vm2, %v104_v19  ;;  %v256_v21 = vmul.f32 %v1115_v17, %v1117_v20  ;;  %v172_v37 = vmul.f32 %v1136_v29, %v1117_v20  ;;  %v316_v1 = vmul.f32 %v1189_v54, %v1117_v20 }
  0xa6   :  { %v196_v5 = vmul.f32 %v1198_v59, %v1117_v20  ;;  %v1238_v12 = vmul.f32 %v1115_v17, %v1216_v3 }
  0xa7   :  { %262 = vrot.lane.b32.xlu0 %v256_v21, %s1046_s9  ;;  %v175_v44 = vadd.f32 %v172_v37, %v1156_v39 }
  0xa8   :  { %v118_v22 = vpop.permute.xlu1 %117  ;;  %v116_v23 = vpop.permute.xlu0 %115  ;;  %v1124_v24 = vld [vmem:[#allocation2 + $0x8] sm:$0xff]  ;;  %v1126_v25 = vld [vmem:[#allocation2 + $0x10] sm:$0x7]  ;;  %v199_v19 = vadd.f32 %v196_v5, %v1219_v4 }
  0xa9   :  { %145 = vst.msk [vmem:[#allocation2 + $0x6a] sm:$0xff] %vm135_vm2, %v118_v22  ;;  %144 = vst.msk [vmem:[#allocation2 + $0x62] sm:$0xff] %vm135_vm2, %v116_v23  ;;  %v257_v26 = vmul.f32 %v1115_v17, %v1124_v24  ;;  %v258_v27 = vmul.f32 %v1115_v17, %v1126_v25  ;;  %v173_v50 = vmul.f32 %v1136_v29, %v1124_v24 }
  0xaa   :  { %v174_v51 = vmul.f32 %v1136_v29, %v1126_v25  ;;  %v318_v11 = vmul.f32 %v1189_v54, %v1126_v25  ;;  %v317_v15 = vmul.f32 %v1189_v54, %v1124_v24  ;;  %v198_v20 = vmul.f32 %v1198_v59, %v1126_v25 }
  0xab   :  { %264 = vrot.lane.b32.xlu1 %v257_v26, %s1046_s9  ;;  %266 = vrot.lane.b32.xlu0 %v258_v27, %s1046_s9  ;;  %v176_v62 = vadd.f32 %v173_v50, %v1156_v39  ;;  %v218_v22 = vmul.f32 %v1136_v29, %v1216_v3  ;;  %v236_v23 = vmul.f32 %v1198_v59, %v1216_v3  ;;  %v1263_v27 = vstv %s1202_s18 }
  0xac   :  { %v110_v30 = vpop.permute.xlu1 %109  ;;  %v108_v31 = vpop.permute.xlu0 %107  ;;  %v1140_v32 = vld [vmem:[#allocation2 + $0x18] sm:$0xff]  ;;  %v1142_v33 = vld [vmem:[#allocation2 + $0x20] sm:$0xff]  ;;  %v1154_v38 = vld [vmem:[#allocation2 + $0x28] sm:$0x7]  ;;  %v177_v63 = vadd.f32 %v174_v51, %v1156_v39  ;;  %v201_v37 = vadd.f32 %v198_v20, %v1219_v4 }
  0xad   :  { %141 = vst.msk [vmem:[#allocation2 + $0x3a] sm:$0xff] %vm135_vm2, %v110_v30  ;;  %140 = vst.msk [vmem:[#allocation2 + $0x32] sm:$0xff] %vm135_vm2, %v108_v31  ;;  %v276_v34 = vmul.f32 %v1134_v28, %v1140_v32  ;;  %v277_v35 = vmul.f32 %v1134_v28, %v1142_v33  ;;  %v180_v42 = vmul.f32 %v1150_v36, %v1140_v32  ;;  %v162_v51 = vld [vmem:[#allocation2 + $0x50] sm:$0xff] }
  0xae   :  { %v278_v43 = vmul.f32 %v1134_v28, %v1154_v38  ;;  %v181_v57 = vmul.f32 %v1150_v36, %v1142_v33  ;;  %v182_v58 = vmul.f32 %v1150_v36, %v1154_v38  ;;  %v204_v16 = vmul.f32 %v1224_v8, %v1140_v32 }
  0xaf   :  { %282 = vrot.lane.b32.xlu1 %v276_v34, %s1046_s9  ;;  %284 = vrot.lane.b32.xlu0 %v277_v35, %s1046_s9  ;;  %v183_v47 = vadd.f32 %v180_v42, %v175_v44  ;;  %v206_v21 = vmul.f32 %v1224_v8, %v1154_v38  ;;  %v337_v26 = vmul.f32 %v1232_v10, %v1142_v33 }
  0xb0   :  { %v122_v40 = vpop.permute.xlu1 %121  ;;  %v120_v41 = vpop.permute.xlu0 %119  ;;  %v184_v6 = vadd.f32 %v181_v57, %v176_v62  ;;  %v185_v7 = vadd.f32 %v182_v58, %v177_v63  ;;  %v1265_v30 = vld [vmem:[#allocation2 + $0x60] sm:$0xff]  ;;  %v207_v25 = vadd.f32 %v204_v16, %v199_v19  ;;  %v197_v31 = vmul.f32 %v1198_v59, %v1124_v24  ;;  %v1282_v44 = vld [vmem:[#allocation2 + $0x70] sm:$0x7] }
  0xb1   :  { %147 = vst.msk [vmem:[#allocation2 + $0x82] sm:$0xff] %vm135_vm2, %v122_v40  ;;  %146 = vst.msk [vmem:[#allocation2 + $0x7a] sm:$0xff] %vm135_vm2, %v120_v41  ;;  %v336_v34 = vmul.f32 %v1232_v10, %v1140_v32  ;;  %v205_v41 = vmul.f32 %v1224_v8, %v1142_v33  ;;  %v338_v42 = vmul.f32 %v1232_v10, %v1154_v38 }
  0xb2   :  { %v200_v32 = vadd.f32 %v197_v31, %v1219_v4  ;;  %v221_v38 = vadd.f32 %v218_v22, %v1156_v39  ;;  %v219_v5 = vmul.f32 %v1136_v29, %v162_v51  ;;  %v237_v16 = vmul.f32 %v1198_v59, %v162_v51 }
  0xb3   :  { %286 = vrot.lane.b32.xlu1 %v278_v43, %s1046_s9  ;;  %v1280_v43 = vld [vmem:[#allocation2 + $0x58] sm:$0x7] }
  0xb4   :  { %v1180_v48 = vld [vmem:[#allocation2 + $0x38] sm:$0xff]  ;;  %v158_v49 = vld [vmem:[#allocation2 + $0x30] sm:$0xff]  ;;  %v1191_v55 = vld [vmem:[#allocation2 + $0x40] sm:$0x7]  ;;  %v240_v20 = vadd.f32 %v237_v16, %v1219_v4 }
  0xb5   :  { %v297_v52 = vmul.f32 %v1171_v45, %v1180_v48  ;;  %v296_v53 = vmul.f32 %v1171_v45, %v158_v49  ;;  %v188_v56 = vmul.f32 %v1178_v46, %v158_v49  ;;  %v189_v60 = vmul.f32 %v1178_v46, %v1180_v48 }
  0xb6   :  { %v190_v0 = vmul.f32 %v1178_v46, %v1191_v55  ;;  %v298_v2 = vmul.f32 %v1171_v45, %v1191_v55  ;;  %v212_v18 = vmul.f32 %v1227_v9, %v158_v49  ;;  %v214_v40 = vmul.f32 %v1227_v9, %v1191_v55 }
  0xb7   :  { %304 = vrot.lane.b32.xlu1 %v297_v52, %s1046_s9  ;;  %302 = vrot.lane.b32.xlu0 %v296_v53, %s1046_s9  ;;  %v1206_v61 = vadd.f32 %v188_v56, %v183_v47  ;;  %v1240_v13 = vadd.f32 %v189_v60, %v184_v6  ;;  %v213_v47 = vmul.f32 %v1227_v9, %v1180_v48  ;;  %v1290_v52 = vld [vmem:[#allocation2 + $0x68] sm:$0xff] }
  0xb8   :  { %v1242_v14 = vadd.f32 %v190_v0, %v185_v7  ;;  %v1271_v35 = vld [vmem:[#allocation2 + $0x78] sm:$0xff]  ;;  %v1284_v24 = vadd.f32 %v212_v18, %v207_v25  ;;  %v356_v50 = vmul.f32 %v1263_v27, %v158_v49  ;;  %v1292_v33 = vld [vmem:[#allocation2 + $0x88] sm:$0x7]  ;;  %v209_v53 = vadd.f32 %v206_v21, %v201_v37  ;;  %v1301_v58 = vld [vmem:[#allocation2 + $0x80] sm:$0xff] }
  0xb9   :  { %v224_v56 = vmul.f32 %v1150_v36, %v1265_v30  ;;  %v357_v57 = vmul.f32 %v1263_v27, %v1180_v48  ;;  %v208_v49 = vadd.f32 %v205_v41, %v200_v32  ;;  %v230_v60 = vmul.f32 %v1178_v46, %v1271_v35 }
  0xba   :  { %v1305_v62 = vadd.f32 %v214_v40, %v209_v53  ;;  %v220_v0 = vmul.f32 %v1136_v29, %v1280_v43  ;;  %v232_v48 = vmul.f32 %v1178_v46, %v1292_v33  ;;  %v225_v6 = vmul.f32 %v1150_v36, %v1290_v52 }
  0xbb   :  { %322 = vrot.lane.b32.xlu1 %v316_v1, %s1046_s9  ;;  %306 = vrot.lane.b32.xlu0 %v298_v2, %s1046_s9  ;;  %v227_v63 = vadd.f32 %v224_v56, %v221_v38  ;;  %v226_v1 = vmul.f32 %v1150_v36, %v1282_v44  ;;  %v1311_v2 = vadd.f32 %v213_v47, %v208_v49  ;;  %v1407_v56 = vld [vmem:[#allocation2 + $0x9] sm:$0xff]  ;;  %v1409_v49 = vld [vmem:[#allocation2 + $0x1] sm:$0xff] }
  0xbc   :  { %v222_v18 = vadd.f32 %v219_v5, %v1156_v39  ;;  %v243_v29 = vmul.f32 %v1224_v8, %v1290_v52  ;;  %v249_v36 = vmul.f32 %v1227_v9, %v1301_v58  ;;  %v239_v21 = vadd.f32 %v236_v23, %v1219_v4 }
  0xbd   :  { %v1318_v7 = vadd.f32 %v230_v60, %v227_v63  ;;  %v244_v25 = vmul.f32 %v1224_v8, %v1282_v44  ;;  %v250_v41 = vmul.f32 %v1227_v9, %v1292_v33  ;;  %v375_v32 = vmul.f32 %v1115_v17, %v162_v51  ;;  %v1415_v63 = vld [vmem:[#allocation2 + $0x11] sm:$0x7] }
  0xbe   :  { %v228_v22 = vadd.f32 %v225_v6, %v222_v18  ;;  %v447_v53 = vmul.f32 %v1232_v10, %v1290_v52  ;;  %v465_v38 = vmul.f32 %v1263_v27, %v1301_v58  ;;  %v645_v60 = vstv %s930_s20 }
  0xbf   :  { %326 = vrot.lane.b32.xlu1 %v318_v11, %s1046_s9  ;;  %324 = vrot.lane.b32.xlu0 %v317_v15, %s1046_s9  ;;  %v223_v11 = vadd.f32 %v220_v0, %v1156_v39  ;;  %v231_v15 = vmul.f32 %v1178_v46, %v1301_v58  ;;  %v242_v46 = vmul.f32 %v1224_v8, %v1265_v30 }
  0xc0   :  { %v238_v39 = vmul.f32 %v1198_v59, %v1280_v43  ;;  %v376_v8 = vmul.f32 %v1115_v17, %v1280_v43  ;;  %v430_v17 = vmul.f32 %v1189_v54, %v1280_v43  ;;  %v358_v43 = vmul.f32 %v1263_v27, %v1191_v55 }
  0xc1   :  { %v229_v19 = vadd.f32 %v226_v1, %v223_v11  ;;  %v245_v37 = vadd.f32 %v242_v46, %v239_v21  ;;  %v1346_v23 = vadd.f32 %v231_v15, %v228_v22  ;;  %v464_v55 = vmul.f32 %v1263_v27, %v1271_v35  ;;  %v1425_v1 = vld [vmem:[#allocation2 + $0x51] sm:$0xff]  ;;  %v1433_v11 = vld [vmem:[#allocation2 + $0x59] sm:$0x7] }
  0xc2   :  { %v241_v40 = vadd.f32 %v238_v39, %v1219_v4  ;;  %v429_v4 = vmul.f32 %v1189_v54, %v162_v51  ;;  %v394_v51 = vmul.f32 %v1134_v28, %v1282_v44  ;;  %v647_v0 = vmul.f32 %v645_v60, %v1407_v56 }
  0xc3   :  { %344 = vrot.lane.b32.xlu1 %v337_v26, %s1046_s9  ;;  %342 = vrot.lane.b32.xlu0 %v336_v34, %s1046_s9  ;;  %v248_v26 = vmul.f32 %v1227_v9, %v1271_v35  ;;  %v1341_v31 = vadd.f32 %v232_v48, %v229_v19  ;;  %v246_v34 = vadd.f32 %v243_v29, %v240_v20  ;;  %v1427_v48 = vld [vmem:[#allocation2 + $0x49] sm:$0xff]  ;;  %v605_v19 = vstv %s928_s21  ;;  %v1445_v20 = vld [vmem:[#allocation2 + $0x19] sm:$0xff] }
  0xc4   :  { %v247_v47 = vadd.f32 %v244_v25, %v241_v40  ;;  %v428_v9 = vmul.f32 %v1189_v54, %v1216_v3  ;;  %v393_v3 = vmul.f32 %v1134_v28, %v1290_v52  ;;  %v446_v54 = vmul.f32 %v1232_v10, %v1265_v30  ;;  %v1461_v40 = vld [vmem:[#allocation2 + $0x69] sm:$0xff] }
  0xc5   :  { %v1351_v59 = vadd.f32 %v249_v36, %v246_v34  ;;  %v411_v52 = vmul.f32 %v1171_v45, %v1301_v58  ;;  %v648_v58 = vmul.f32 %v645_v60, %v1415_v63  ;;  %v758_v15 = vmul.f32 %v645_v60, %v1427_v48  ;;  %v1443_v36 = vld [vmem:[#allocation2 + $0x21] sm:$0xff] }
  0xc6   :  { %v760_v18 = vmul.f32 %v645_v60, %v1433_v11  ;;  %v759_v29 = vmul.f32 %v645_v60, %v1425_v1  ;;  %v607_v21 = vmul.f32 %v605_v19, %v1443_v36  ;;  %v606_v46 = vmul.f32 %v605_v19, %v1445_v20 }
  0xc7   :  { %362 = vrot.lane.b32.xlu1 %v356_v50, %s1046_s9  ;;  %346 = vrot.lane.b32.xlu0 %v338_v42, %s1046_s9  ;;  %v1353_v42 = vadd.f32 %v248_v26, %v245_v37  ;;  %v392_v50 = vmul.f32 %v1134_v28, %v1265_v30  ;;  %v448_v28 = vmul.f32 %v1232_v10, %v1282_v44  ;;  %v665_v22 = vstv %s931_s22  ;;  %v1451_v26 = vld [vmem:[#allocation2 + $0x29] sm:$0x7] }
  0xc8   :  { %v410_v30 = vmul.f32 %v1171_v45, %v1271_v35  ;;  %v412_v10 = vmul.f32 %v1171_v45, %v1292_v33  ;;  %v466_v44 = vmul.f32 %v1263_v27, %v1292_v33  ;;  %v646_v27 = vmul.f32 %v645_v60, %v1409_v49 }
  0xc9   :  { %v666_v39 = vmul.f32 %v665_v22, %v1445_v20  ;;  %v608_v25 = vmul.f32 %v605_v19, %v1451_v26  ;;  %v668_v34 = vmul.f32 %v665_v22, %v1451_v26  ;;  %v667_v37 = vmul.f32 %v665_v22, %v1443_v36 }
  0xcb   :  { %380 = vrot.lane.b32.xlu1 %v1238_v12, %s1046_s9  ;;  %364 = vrot.lane.b32.xlu0 %v357_v57, %s1046_s9  ;;  %v1360_v12 = vadd.f32 %v250_v41, %v247_v47  ;;  %v585_v57 = vstv %s927_s19  ;;  %v1463_v41 = vld [vmem:[#allocation2 + $0x61] sm:$0xff]  ;;  %v1469_v47 = vld [vmem:[#allocation2 + $0x71] sm:$0x7] }
  0xcc   :  { %v587_v45 = vmul.f32 %v585_v57, %v1407_v56  ;;  %v586_v35 = vmul.f32 %v585_v57, %v1409_v49  ;;  %v588_v33 = vmul.f32 %v585_v57, %v1415_v63  ;;  %v705_v5 = vmul.f32 %v585_v57, %v1425_v1 }
  0xcd   :  { %v704_v6 = vmul.f32 %v585_v57, %v1427_v48  ;;  %v706_v16 = vmul.f32 %v585_v57, %v1433_v11  ;;  %v1494_v57 = vstv %s932_s0 }
  0xcf   :  { %384 = vrot.lane.b32.xlu1 %v376_v8, %s1046_s9  ;;  %382 = vrot.lane.b32.xlu0 %v375_v32, %s1046_s9  ;;  %v723_v8 = vmul.f32 %v605_v19, %v1461_v40  ;;  %v722_v32 = vmul.f32 %v605_v19, %v1463_v41 }
  0xd3   :  { %436 = vrot.lane.b32.xlu1 %v429_v4, %s1046_s9  ;;  %434 = vrot.lane.b32.xlu0 %v428_v9, %s1046_s9  ;;  %v776_v9 = vmul.f32 %v665_v22, %v1463_v41 }
  0xd7   :  { %398 = vrot.lane.b32.xlu1 %v392_v50, %s1046_s9  ;;  %438 = vrot.lane.b32.xlu0 %v430_v17, %s1046_s9  ;;  %v724_v50 = vmul.f32 %v605_v19, %v1469_v47 }
  0xdb   :  { %402 = vrot.lane.b32.xlu1 %v394_v51, %s1046_s9  ;;  %400 = vrot.lane.b32.xlu0 %v393_v3, %s1046_s9 }
  0xdf   :  { %454 = vrot.lane.b32.xlu1 %v447_v53, %s1046_s9  ;;  %452 = vrot.lane.b32.xlu0 %v446_v54, %s1046_s9  ;;  %v778_v53 = vmul.f32 %v665_v22, %v1469_v47  ;;  %v777_v54 = vmul.f32 %v665_v22, %v1461_v40  ;;  %v1520_v22 = vld [vmem:[#allocation2 + $0x81] sm:$0xff] }
  0xe3   :  { %366 = vrot.lane.b32.xlu1 %v358_v43, %s1046_s9  ;;  %456 = vrot.lane.b32.xlu0 %v448_v28, %s1046_s9 }
  0xe7   :  { %418 = vrot.lane.b32.xlu1 %v411_v52, %s1046_s9  ;;  %416 = vrot.lane.b32.xlu0 %v410_v30, %s1046_s9  ;;  %v1482_v52 = vld [vmem:[#allocation2 + $0x39] sm:$0xff]  ;;  %v1484_v30 = vstv %s929_s23 }
  0xeb   :  { %470 = vrot.lane.b32.xlu1 %v464_v55, %s1046_s9  ;;  %420 = vrot.lane.b32.xlu0 %v412_v10, %s1046_s9 }
  0xef   :  { %474 = vrot.lane.b32.xlu1 %v466_v44, %s1046_s9  ;;  %472 = vrot.lane.b32.xlu0 %v465_v38, %s1046_s9  ;;  %v627_v44 = vmul.f32 %v1484_v30, %v1482_v52 }
  0xf3   :  { %594 = vrot.lane.b32.xlu1 %v587_v45, %s1046_s9  ;;  %592 = vrot.lane.b32.xlu0 %v586_v35, %s1046_s9  ;;  %v1496_v45 = vld [vmem:[#allocation2 + $0x41] sm:$0x7] }
  0xf7   :  { %652 = vrot.lane.b32.xlu1 %v646_v27, %s1046_s9  ;;  %596 = vrot.lane.b32.xlu0 %v588_v33, %s1046_s9  ;;  %v628_v27 = vmul.f32 %v1484_v30, %v1496_v45 }
  0xfb   :  { %656 = vrot.lane.b32.xlu1 %v648_v58, %s1046_s9  ;;  %654 = vrot.lane.b32.xlu0 %v647_v0, %s1046_s9  ;;  %v1506_v58 = vstv %s921_s1 }
  0xff   :  { %712 = vrot.lane.b32.xlu1 %v705_v5, %s1046_s9  ;;  %710 = vrot.lane.b32.xlu0 %v704_v6, %s1046_s9  ;;  %v688_v6 = vmul.f32 %v1494_v57, %v1496_v45 }
 0x103   :  { %764 = vrot.lane.b32.xlu1 %v758_v15, %s1046_s9  ;;  %714 = vrot.lane.b32.xlu0 %v706_v16, %s1046_s9  ;;  %v687_v15 = vmul.f32 %v1494_v57, %v1482_v52  ;;  %v1512_v16 = vstv %s922_s24 }
 0x107   :  { %768 = vrot.lane.b32.xlu1 %v760_v18, %s1046_s9  ;;  %766 = vrot.lane.b32.xlu0 %v759_v29, %s1046_s9  ;;  %v1514_v18 = vstv %s923_s25  ;;  %v503_v29 = vmul.f32 %v1506_v58, %v1407_v56 }
 0x10b   :  { %614 = vrot.lane.b32.xlu1 %v607_v21, %s1046_s9  ;;  %612 = vrot.lane.b32.xlu0 %v606_v46, %s1046_s9  ;;  %v502_v21 = vmul.f32 %v1506_v58, %v1409_v49 }
 0x10f   :  { %672 = vrot.lane.b32.xlu1 %v666_v39, %s1046_s9  ;;  %616 = vrot.lane.b32.xlu0 %v608_v25, %s1046_s9  ;;  %v1522_v39 = vld [vmem:[#allocation2 + $0x79] sm:$0xff]  ;;  %v504_v25 = vmul.f32 %v1506_v58, %v1415_v63 }
 0x113   :  { %676 = vrot.lane.b32.xlu1 %v668_v34, %s1046_s9  ;;  %674 = vrot.lane.b32.xlu0 %v667_v37, %s1046_s9 }
 0x117   :  { %730 = vrot.lane.b32.xlu1 %v723_v8, %s1046_s9  ;;  %728 = vrot.lane.b32.xlu0 %v722_v32, %s1046_s9  ;;  %v511_v8 = vmul.f32 %v1512_v16, %v1443_v36  ;;  %v510_v32 = vmul.f32 %v1512_v16, %v1445_v20 }
 0x119   :  { %v263_v4 = vpop.permute.xlu0 %262 }
 0x11a   :  { %v271_v17 = vadd.f32 %v263_v4, %v1206_v61  ;;  %v1486_v61 = vld [vmem:[#allocation2 + $0x31] sm:$0xff] }
 0x11b   :  { %782 = vrot.lane.b32.xlu1 %v776_v9, %s1046_s9  ;;  %732 = vrot.lane.b32.xlu0 %v724_v50, %s1046_s9  ;;  %v686_v60 = vmul.f32 %v1494_v57, %v1486_v61  ;;  %v741_v50 = vmul.f32 %v1484_v30, %v1520_v22 }
 0x11d   :  { %v265_v51 = vpop.permute.xlu1 %264  ;;  %v267_v3 = vpop.permute.xlu0 %266 }
 0x11e   :  { %v272_v43 = vadd.f32 %v265_v51, %v1240_v13  ;;  %v273_v28 = vadd.f32 %v267_v3, %v1242_v14  ;;  %v626_v13 = vmul.f32 %v1484_v30, %v1486_v61  ;;  %v519_v51 = vmul.f32 %v1514_v18, %v1482_v52 }
 0x11f   :  { %786 = vrot.lane.b32.xlu1 %v778_v53, %s1046_s9  ;;  %784 = vrot.lane.b32.xlu0 %v777_v54, %s1046_s9  ;;  %v518_v3 = vmul.f32 %v1514_v18, %v1486_v61 }
 0x121   :  { %v283_v55 = vpop.permute.xlu1 %282  ;;  %v285_v10 = vpop.permute.xlu0 %284 }
 0x122   :  { %v291_v14 = vadd.f32 %v283_v55, %v271_v17  ;;  %v292_v38 = vadd.f32 %v285_v10, %v272_v43  ;;  %v740_v17 = vmul.f32 %v1484_v30, %v1522_v39  ;;  %v1541_v43 = vld [vmem:[#allocation2 + $0x89] sm:$0x7] }
 0x123   :  { %634 = vrot.lane.b32.xlu1 %v627_v44, %s1046_s9  ;;  %632 = vrot.lane.b32.xlu0 %v626_v13, %s1046_s9 }
 0x125   :  { %v287_v35 = vpop.permute.xlu1 %286 }
 0x126   :  { %v293_v33 = vadd.f32 %v287_v35, %v273_v28  ;;  %v794_v35 = vmul.f32 %v1494_v57, %v1522_v39 }
 0x127   :  { %692 = vrot.lane.b32.xlu1 %v686_v60, %s1046_s9  ;;  %636 = vrot.lane.b32.xlu0 %v628_v27, %s1046_s9  ;;  %v742_v60 = vmul.f32 %v1484_v30, %v1541_v43  ;;  %v796_v30 = vmul.f32 %v1494_v57, %v1541_v43 }
 0x129   :  { %v305_v0 = vpop.permute.xlu1 %304  ;;  %v303_v5 = vpop.permute.xlu0 %302 }
 0x12a   :  { %v312_v19 = vadd.f32 %v305_v0, %v292_v38  ;;  %v311_v46 = vadd.f32 %v303_v5, %v291_v14  ;;  %v512_v14 = vmul.f32 %v1512_v16, %v1451_v26  ;;  %v520_v5 = vmul.f32 %v1514_v18, %v1496_v45 }
 0x12b   :  { %696 = vrot.lane.b32.xlu1 %v688_v6, %s1046_s9  ;;  %694 = vrot.lane.b32.xlu0 %v687_v15, %s1046_s9 }
 0x12c   :  { %v506_v34 = vadd.f32 %v503_v29, %v312_v19  ;;  %v505_v37 = vadd.f32 %v502_v21, %v311_v46  ;;  %v1569_v21 = vstv %s924_s26 }
 0x12d   :  { %v323_v4 = vpop.permute.xlu1 %322  ;;  %v307_v9 = vpop.permute.xlu0 %306 }
 0x12e   :  { %v331_v53 = vadd.f32 %v323_v4, %v1284_v24  ;;  %v313_v54 = vadd.f32 %v307_v9, %v293_v33  ;;  %v514_v28 = vadd.f32 %v511_v8, %v506_v34  ;;  %v513_v55 = vadd.f32 %v510_v32, %v505_v37 }
 0x12f   :  { %748 = vrot.lane.b32.xlu1 %v741_v50, %s1046_s9  ;;  %746 = vrot.lane.b32.xlu0 %v740_v17, %s1046_s9  ;;  %v1571_v34 = vstv %s925_s27  ;;  %v526_v37 = vmul.f32 %v1569_v21, %v1409_v49  ;;  %v1575_v4 = vstv %s926_s28  ;;  %v527_v17 = vmul.f32 %v1569_v21, %v1407_v56 }
 0x130   :  { %v507_v10 = vadd.f32 %v504_v25, %v313_v54  ;;  %v1545_v44 = vadd.f32 %v519_v51, %v514_v28  ;;  %v1547_v13 = vadd.f32 %v518_v3, %v513_v55  ;;  %v534_v9 = vmul.f32 %v1571_v34, %v1445_v20 }
 0x131   :  { %v327_v38 = vpop.permute.xlu1 %326  ;;  %v325_v24 = vpop.permute.xlu0 %324  ;;  %v542_v54 = vmul.f32 %v1575_v4, %v1486_v61 }
 0x132   :  { %v333_v27 = vadd.f32 %v327_v38, %v1305_v62  ;;  %v332_v33 = vadd.f32 %v325_v24, %v1311_v2  ;;  %v515_v0 = vadd.f32 %v512_v14, %v507_v10  ;;  %v795_v62 = vmul.f32 %v1494_v57, %v1520_v22 }
 0x133   :  { %800 = vrot.lane.b32.xlu1 %v794_v35, %s1046_s9  ;;  %750 = vrot.lane.b32.xlu0 %v742_v60, %s1046_s9  ;;  %v535_v10 = vmul.f32 %v1571_v34, %v1443_v36 }
 0x134   :  { %v1561_v6 = vadd.f32 %v520_v5, %v515_v0 }
 0x135   :  { %v345_v15 = vpop.permute.xlu1 %344  ;;  %v343_v29 = vpop.permute.xlu0 %342 }
 0x136   :  { %v352_v2 = vadd.f32 %v345_v15, %v332_v33  ;;  %v351_v19 = vadd.f32 %v343_v29, %v331_v53 }
 0x137   :  { %804 = vrot.lane.b32.xlu1 %v796_v30, %s1046_s9  ;;  %802 = vrot.lane.b32.xlu0 %v795_v62, %s1046_s9 }
 0x139   :  { %v363_v46 = vpop.permute.xlu1 %362  ;;  %v347_v25 = vpop.permute.xlu0 %346 }
 0x13a   :  { %v371_v8 = vadd.f32 %v363_v46, %v351_v19  ;;  %v353_v32 = vadd.f32 %v347_v25, %v333_v27 }
 0x13c   :  { %v529_v57 = vadd.f32 %v526_v37, %v371_v8 }
 0x13d   :  { %v381_v50 = vpop.permute.xlu1 %380  ;;  %v365_v51 = vpop.permute.xlu0 %364 }
 0x13e   :  { %v389_v3 = vadd.f32 %v381_v50, %v1318_v7  ;;  %v372_v53 = vadd.f32 %v365_v51, %v352_v2  ;;  %v537_v49 = vadd.f32 %v534_v9, %v529_v57  ;;  %v543_v7 = vmul.f32 %v1575_v4, %v1482_v52 }
 0x13f   :  { %v536_v57 = vmul.f32 %v1571_v34, %v1451_v26  ;;  %v548_v50 = vmul.f32 %v1506_v58, %v1427_v48 }
 0x140   :  { %v530_v28 = vadd.f32 %v527_v17, %v372_v53  ;;  %v1584_v55 = vadd.f32 %v542_v54, %v537_v49  ;;  %v544_v53 = vmul.f32 %v1575_v4, %v1496_v45  ;;  %v561_v45 = vmul.f32 %v1514_v18, %v1520_v22 }
 0x141   :  { %v385_v14 = vpop.permute.xlu1 %384  ;;  %v383_v20 = vpop.permute.xlu0 %382 }
 0x142   :  { %v391_v38 = vadd.f32 %v385_v14, %v1341_v31  ;;  %v390_v56 = vadd.f32 %v383_v20, %v1346_v23  ;;  %v538_v24 = vadd.f32 %v535_v10, %v530_v28  ;;  %v554_v28 = vmul.f32 %v1512_v16, %v1463_v41 }
 0x143   :  { %v566_v10 = vmul.f32 %v1569_v21, %v1427_v48  ;;  %v550_v20 = vmul.f32 %v1506_v58, %v1433_v11  ;;  %v556_v48 = vmul.f32 %v1512_v16, %v1469_v47 }
 0x144   :  { %v1592_v35 = vadd.f32 %v543_v7, %v538_v24 }
 0x145   :  { %v437_v61 = vpop.permute.xlu1 %436  ;;  %v435_v60 = vpop.permute.xlu0 %434 }
 0x146   :  { %v444_v27 = vadd.f32 %v437_v61, %v1351_v59  ;;  %v443_v33 = vadd.f32 %v435_v60, %v1353_v42  ;;  %v528_v59 = vmul.f32 %v1569_v21, %v1415_v63 }
 0x149   :  { %v399_v0 = vpop.permute.xlu1 %398  ;;  %v439_v36 = vpop.permute.xlu0 %438 }
 0x14a   :  { %v407_v5 = vadd.f32 %v399_v0, %v389_v3  ;;  %v445_v15 = vadd.f32 %v439_v36, %v1360_v12  ;;  %v549_v12 = vmul.f32 %v1506_v58, %v1425_v1 }
 0x14d   :  { %v403_v31 = vpop.permute.xlu1 %402  ;;  %v401_v29 = vpop.permute.xlu0 %400 }
 0x14e   :  { %v409_v23 = vadd.f32 %v403_v31, %v391_v38  ;;  %v408_v30 = vadd.f32 %v401_v29, %v390_v56  ;;  %v560_v56 = vmul.f32 %v1514_v18, %v1522_v39  ;;  %v567_v31 = vmul.f32 %v1569_v21, %v1425_v1 }
 0x151   :  { %v455_v62 = vpop.permute.xlu1 %454  ;;  %v453_v2 = vpop.permute.xlu0 %452 }
 0x152   :  { %v462_v52 = vadd.f32 %v455_v62, %v444_v27  ;;  %v461_v19 = vadd.f32 %v453_v2, %v443_v33  ;;  %v572_v27 = vmul.f32 %v1571_v34, %v1463_v41  ;;  %v578_v41 = vmul.f32 %v1575_v4, %v1522_v39 }
 0x155   :  { %v367_v46 = vpop.permute.xlu1 %366  ;;  %v457_v25 = vpop.permute.xlu0 %456 }
 0x156   :  { %v373_v37 = vadd.f32 %v367_v46, %v353_v32  ;;  %v463_v42 = vadd.f32 %v457_v25, %v445_v15  ;;  %v555_v32 = vmul.f32 %v1512_v16, %v1461_v40  ;;  %v562_v16 = vmul.f32 %v1514_v18, %v1541_v43 }
 0x157   :  { %v580_v18 = vmul.f32 %v1575_v4, %v1541_v43 }
 0x158   :  { %v531_v8 = vadd.f32 %v528_v59, %v373_v37 }
 0x159   :  { %v419_v9 = vpop.permute.xlu1 %418  ;;  %v417_v17 = vpop.permute.xlu0 %416 }
 0x15a   :  { %v426_v51 = vadd.f32 %v419_v9, %v408_v30  ;;  %v425_v3 = vadd.f32 %v417_v17, %v407_v5  ;;  %v539_v63 = vadd.f32 %v536_v57, %v531_v8  ;;  %v568_v5 = vmul.f32 %v1569_v21, %v1433_v11 }
 0x15b   :  { %v573_v11 = vmul.f32 %v1571_v34, %v1461_v40 }
 0x15c   :  { %v552_v54 = vadd.f32 %v549_v12, %v426_v51  ;;  %v551_v49 = vadd.f32 %v548_v50, %v425_v3  ;;  %v1609_v26 = vadd.f32 %v544_v53, %v539_v63 }
 0x15d   :  { %v471_v14 = vpop.permute.xlu1 %470  ;;  %v421_v38 = vpop.permute.xlu0 %420 }
 0x15e   :  { %v479_v24 = vadd.f32 %v471_v14, %v461_v19  ;;  %v427_v7 = vadd.f32 %v421_v38, %v409_v23  ;;  %v558_v61 = vadd.f32 %v555_v32, %v552_v54  ;;  %v557_v60 = vadd.f32 %v554_v28, %v551_v49 }
 0x15f   :  { %v574_v19 = vmul.f32 %v1571_v34, %v1469_v47 }
 0x160   :  { %v569_v33 = vadd.f32 %v566_v10, %v479_v24  ;;  %v553_v0 = vadd.f32 %v550_v20, %v427_v7  ;;  %v1625_v58 = vadd.f32 %v561_v45, %v558_v61  ;;  %v1627_v36 = vadd.f32 %v560_v56, %v557_v60 }
 0x161   :  { %v475_v15 = vpop.permute.xlu1 %474  ;;  %v473_v29 = vpop.permute.xlu0 %472 }
 0x162   :  { %v481_v23 = vadd.f32 %v475_v15, %v463_v42  ;;  %v480_v30 = vadd.f32 %v473_v29, %v462_v52  ;;  %v575_v62 = vadd.f32 %v572_v27, %v569_v33  ;;  %v559_v2 = vadd.f32 %v556_v48, %v553_v0 }
 0x163   :  { %v579_v42 = vmul.f32 %v1575_v4, %v1520_v22 }
 0x164   :  { %v571_v46 = vadd.f32 %v568_v5, %v481_v23  ;;  %v570_v25 = vadd.f32 %v567_v31, %v480_v30  ;;  %v1641_v1 = vadd.f32 %v578_v41, %v575_v62  ;;  %v1643_v21 = vadd.f32 %v562_v16, %v559_v2 }
 0x165   :  { %v595_v39 = vpop.permute.xlu1 %594  ;;  %v593_v59 = vpop.permute.xlu0 %592 }
 0x166   :  { %v577_v52 = vadd.f32 %v574_v19, %v571_v46  ;;  %v576_v37 = vadd.f32 %v573_v11, %v570_v25  ;;  %v602_v45 = vadd.f32 %v595_v39, %v1545_v44  ;;  %v601_v56 = vadd.f32 %v593_v59, %v1547_v13 }
 0x168   :  { %v1649_v47 = vadd.f32 %v580_v18, %v577_v52  ;;  %v1651_v8 = vadd.f32 %v579_v42, %v576_v37 }
 0x169   :  { %v653_v40 = vpop.permute.xlu1 %652  ;;  %v597_v34 = vpop.permute.xlu0 %596 }
 0x16a   :  { %v661_v27 = vadd.f32 %v653_v40, %v1584_v55  ;;  %v603_v48 = vadd.f32 %v597_v34, %v1561_v6 }
 0x16d   :  { %v657_v57 = vpop.permute.xlu1 %656  ;;  %v655_v12 = vpop.permute.xlu0 %654 }
 0x16e   :  { %v663_v55 = vadd.f32 %v657_v57, %v1609_v26  ;;  %v662_v6 = vadd.f32 %v655_v12, %v1592_v35 }
 0x171   :  { %v713_v9 = vpop.permute.xlu1 %712  ;;  %v711_v50 = vpop.permute.xlu0 %710 }
 0x172   :  { %v720_v26 = vadd.f32 %v713_v9, %v1625_v58  ;;  %v719_v11 = vadd.f32 %v711_v50, %v1627_v36 }
 0x175   :  { %v1653_v17 = vpop.permute.xlu1 %764  ;;  %v1655_v51 = vpop.permute.xlu0 %714 }
 0x176   :  { %v773_v36 = vadd.f32 %v1653_v17, %v1641_v1  ;;  %v721_v34 = vadd.f32 %v1655_v51, %v1643_v21 }
 0x179   :  { %v1657_v43 = vpop.permute.xlu1 %768  ;;  %v1659_v3 = vpop.permute.xlu0 %766 }
 0x17a   :  { %v775_v21 = vadd.f32 %v1657_v43, %v1649_v47 }
 0x17d   :  { %v615_v53 = vpop.permute.xlu1 %614  ;;  %v613_v22 = vpop.permute.xlu0 %612 }
 0x17e   :  { %v622_v24 = vadd.f32 %v615_v53, %v602_v45  ;;  %v621_v7 = vadd.f32 %v613_v22, %v601_v56 }
 0x181   :  { %v673_v4 = vpop.permute.xlu1 %672  ;;  %v617_v63 = vpop.permute.xlu0 %616 }
 0x182   :  { %v681_v5 = vadd.f32 %v673_v4, %v661_v27  ;;  %v623_v15 = vadd.f32 %v617_v63, %v603_v48 }
 0x185   :  { %v677_v32 = vpop.permute.xlu1 %676  ;;  %v675_v54 = vpop.permute.xlu0 %674 }
 0x186   :  { %v683_v62 = vadd.f32 %v677_v32, %v663_v55  ;;  %v682_v2 = vadd.f32 %v675_v54, %v662_v6 }
 0x189   :  { %v731_v49 = vpop.permute.xlu1 %730  ;;  %v729_v28 = vpop.permute.xlu0 %728 }
 0x18a   :  { %v738_v37 = vadd.f32 %v731_v49, %v720_v26  ;;  %v737_v42 = vadd.f32 %v729_v28, %v719_v11 }
 0x18d   :  { %v783_v10 = vpop.permute.xlu1 %782  ;;  %v733_v14 = vpop.permute.xlu0 %732 }
 0x18e   :  { %v791_v4 = vadd.f32 %v783_v10, %v773_v36  ;;  %v739_v63 = vadd.f32 %v733_v14, %v721_v34  ;;  %v774_v14 = vadd.f32 %v1659_v3, %v1651_v8 }
 0x191   :  { %v1661_v20 = vpop.permute.xlu1 %786  ;;  %v1663_v38 = vpop.permute.xlu0 %784 }
 0x192   :  { %v793_v45 = vadd.f32 %v1661_v20, %v775_v21 }
 0x195   :  { %v635_v61 = vpop.permute.xlu1 %634  ;;  %v633_v60 = vpop.permute.xlu0 %632 }
 0x196   :  { %v642_v33 = vadd.f32 %v635_v61, %v622_v24  ;;  %v641_v0 = vadd.f32 %v633_v60, %v621_v7  ;;  %v792_v24 = vadd.f32 %v1663_v38, %v774_v14 }
 0x198   :  { %814 = vst.msk [vmem:[%s1782_s3 + $0x8] sm:$0xff] %vm812_vm3, %v642_v33  ;;  %v827_v44 = vsub.f32 0.0, %v642_v33  ;;  %813 = vst.msk [vmem:[%s1782_s3] sm:$0xff] %vm812_vm3, %v641_v0  ;;  %v826_v13 = vsub.f32 0.0, %v641_v0 }
 0x199   :  { %v693_v31 = vpop.permute.xlu1 %692  ;;  %v637_v29 = vpop.permute.xlu0 %636 }
 0x19a   :  { %v840_v41 = vmul.f32 1.442695, %v827_v44  ;;  %v838_v16 = vmul.f32 1.442695, %v826_v13  ;;  %v701_v23 = vadd.f32 %v693_v31, %v681_v5  ;;  %v643_v30 = vadd.f32 %v637_v29, %v623_v15 }
 0x19c   :  { %941 = vpow2.f32 %v840_v41  ;;  %817 = vst.msk [vmem:[%s1782_s3 + $0x18] sm:$0xff] %vm812_vm3, %v701_v23  ;;  %v829_v19 = vsub.f32 0.0, %v701_v23  ;;  %v828_v35 = vsub.f32 0.0, %v643_v30 }
 0x19d   :  { %816 = vst.msk [vmem:[%s1782_s3 + $0x10] sm:$0x7] %vm815_vm4, %v643_v30  ;;  %943 = vpow2.f32 %v838_v16  ;;  %v697_v46 = vpop.permute.xlu1 %696  ;;  %v695_v25 = vpop.permute.xlu0 %694 }
 0x19e   :  { %v844_v39 = vmul.f32 1.442695, %v829_v19  ;;  %v842_v59 = vmul.f32 1.442695, %v828_v35  ;;  %v703_v18 = vadd.f32 %v697_v46, %v683_v62  ;;  %v702_v52 = vadd.f32 %v695_v25, %v682_v2 }
 0x1a0   :  { %945 = vpow2.f32 %v844_v39  ;;  %819 = vst.msk [vmem:[%s1782_s3 + $0x28] sm:$0x7] %vm815_vm4, %v703_v18  ;;  %v831_v40 = vsub.f32 0.0, %v703_v18  ;;  %v830_v58 = vsub.f32 0.0, %v702_v52 }
 0x1a1   :  { %818 = vst.msk [vmem:[%s1782_s3 + $0x20] sm:$0xff] %vm812_vm3, %v702_v52  ;;  %947 = vpow2.f32 %v842_v59  ;;  %v749_v57 = vpop.permute.xlu1 %748  ;;  %v747_v12 = vpop.permute.xlu0 %746 }
 0x1a2   :  { %v848_v9 = vmul.f32 1.442695, %v831_v40  ;;  %v846_v50 = vmul.f32 1.442695, %v830_v58  ;;  %v756_v53 = vadd.f32 %v749_v57, %v738_v37  ;;  %v755_v22 = vadd.f32 %v747_v12, %v737_v42 }
 0x1a4   :  { %949 = vpow2.f32 %v848_v9  ;;  %821 = vst.msk [vmem:[%s1782_s3 + $0x38] sm:$0xff] %vm812_vm3, %v756_v53  ;;  %v833_v32 = vsub.f32 0.0, %v756_v53  ;;  %820 = vst.msk [vmem:[%s1782_s3 + $0x30] sm:$0xff] %vm812_vm3, %v755_v22  ;;  %v832_v1 = vsub.f32 0.0, %v755_v22 }
 0x1a5   :  { %951 = vpow2.f32 %v846_v50  ;;  %v801_v17 = vpop.permute.xlu1 %800  ;;  %v751_v51 = vpop.permute.xlu0 %750 }
 0x1a6   :  { %v852_v54 = vmul.f32 1.442695, %v833_v32  ;;  %v850_v49 = vmul.f32 1.442695, %v832_v1  ;;  %v809_v28 = vadd.f32 %v801_v17, %v791_v4  ;;  %v757_v10 = vadd.f32 %v751_v51, %v739_v63 }
 0x1a8   :  { %953 = vpow2.f32 %v852_v54  ;;  %823 = vst.msk [vmem:[%s1782_s3 + $0x48] sm:$0xff] %vm812_vm3, %v809_v28  ;;  %v835_v56 = vsub.f32 0.0, %v809_v28  ;;  %v834_v47 = vsub.f32 0.0, %v757_v10 }
 0x1a9   :  { %822 = vst.msk [vmem:[%s1782_s3 + $0x40] sm:$0x7] %vm815_vm4, %v757_v10  ;;  %v942_v43 = vpop.eup %941  ;;  %955 = vpow2.f32 %v850_v49  ;;  %v805_v8 = vpop.permute.xlu1 %804 }
 0x1aa   :  { %v803_v3 = vpop.permute.xlu0 %802  ;;  %v944_v20 = vpop.eup %943  ;;  %v863_v7 = vadd.f32 1.0, %v942_v43  ;;  %v856_v61 = vmul.f32 1.442695, %v835_v56  ;;  %v811_v60 = vadd.f32 %v805_v8, %v793_v45  ;;  %v854_v48 = vmul.f32 1.442695, %v834_v47 }
 0x1ab   :  { %v862_v27 = vadd.f32 1.0, %v944_v20  ;;  %v810_v33 = vadd.f32 %v803_v3, %v792_v24 }
 0x1ac   :  { %957 = vrcp.f32 %v863_v7  ;;  %825 = vst.msk [vmem:[%s1782_s3 + $0x58] sm:$0x7] %vm815_vm4, %v811_v60  ;;  %v837_v0 = vsub.f32 0.0, %v811_v60 }
 0x1ad   :  { %v946_v5 = vpop.eup %945  ;;  %959 = vrcp.f32 %v862_v27  ;;  %824 = vst.msk [vmem:[%s1782_s3 + $0x50] sm:$0xff] %vm812_vm3, %v810_v33  ;;  %v836_v38 = vsub.f32 0.0, %v810_v33 }
 0x1ae   :  { %v948_v15 = vpop.eup %947  ;;  %v865_v44 = vadd.f32 1.0, %v946_v5  ;;  %961 = vpow2.f32 %v856_v61  ;;  %v860_v13 = vmul.f32 1.442695, %v837_v0 }
 0x1af   :  { %v864_v55 = vadd.f32 1.0, %v948_v15  ;;  %963 = vpow2.f32 %v854_v48  ;;  %v858_v6 = vmul.f32 1.442695, %v836_v38 }
 0x1b0   :  { %965 = vrcp.f32 %v865_v44 }
 0x1b1   :  { %v950_v31 = vpop.eup %949  ;;  %967 = vrcp.f32 %v864_v55 }
 0x1b2   :  { %v952_v29 = vpop.eup %951  ;;  %v867_v41 = vadd.f32 1.0, %v950_v31  ;;  %969 = vpow2.f32 %v860_v13 }
 0x1b3   :  { %v866_v16 = vadd.f32 1.0, %v952_v29  ;;  %971 = vpow2.f32 %v858_v6 }
 0x1b4   :  { %973 = vrcp.f32 %v867_v41 }
 0x1b5   :  { %v954_v23 = vpop.eup %953  ;;  %975 = vrcp.f32 %v866_v16 }
 0x1b6   :  { %v956_v30 = vpop.eup %955  ;;  %v869_v62 = vadd.f32 1.0, %v954_v23 }
 0x1b7   :  { %v868_v2 = vadd.f32 1.0, %v956_v30 }
 0x1b8   :  { %977 = vrcp.f32 %v869_v62 }
 0x1b9   :  { %v958_v19 = vpop.eup %957  ;;  %979 = vrcp.f32 %v868_v2 }
 0x1ba   :  { %v960_v35 = vpop.eup %959  ;;  %887 = vst.msk [vmem:[%s1783_s4 + $0x8] sm:$0xff] %vm812_vm3, %v958_v19 }
 0x1bb   :  { %v962_v26 = vpop.eup %961  ;;  %886 = vst.msk [vmem:[%s1783_s4] sm:$0xff] %vm812_vm3, %v960_v35 }
 0x1bc   :  { %v964_v11 = vpop.eup %963  ;;  %v871_v46 = vadd.f32 1.0, %v962_v26 }
 0x1bd   :  { %v966_v25 = vpop.eup %965  ;;  %v870_v39 = vadd.f32 1.0, %v964_v11 }
 0x1be   :  { %v968_v59 = vpop.eup %967  ;;  %889 = vst.msk [vmem:[%s1783_s4 + $0x18] sm:$0xff] %vm812_vm3, %v966_v25  ;;  %981 = vrcp.f32 %v871_v46 }
 0x1bf   :  { %v970_v18 = vpop.eup %969  ;;  %888 = vst.msk [vmem:[%s1783_s4 + $0x10] sm:$0x7] %vm815_vm4, %v968_v59  ;;  %983 = vrcp.f32 %v870_v39 }
 0x1c0   :  { %v972_v52 = vpop.eup %971  ;;  %v873_v37 = vadd.f32 1.0, %v970_v18 }
 0x1c1   :  { %v974_v42 = vpop.eup %973  ;;  %v872_v40 = vadd.f32 1.0, %v972_v52 }
 0x1c2   :  { %v976_v58 = vpop.eup %975  ;;  %891 = vst.msk [vmem:[%s1783_s4 + $0x28] sm:$0x7] %vm815_vm4, %v974_v42  ;;  %985 = vrcp.f32 %v873_v37 }
 0x1c3   :  { %890 = vst.msk [vmem:[%s1783_s4 + $0x20] sm:$0xff] %vm812_vm3, %v976_v58  ;;  %987 = vrcp.f32 %v872_v40 }
 0x1c5   :  { %v978_v36 = vpop.eup %977 }
 0x1c6   :  { %v980_v34 = vpop.eup %979  ;;  %893 = vst.msk [vmem:[%s1783_s4 + $0x38] sm:$0xff] %vm812_vm3, %v978_v36 }
 0x1c7   :  { %892 = vst.msk [vmem:[%s1783_s4 + $0x30] sm:$0xff] %vm812_vm3, %v980_v34 }
 0x1cb   :  { %v982_v57 = vpop.eup %981 }
 0x1cc   :  { %v984_v12 = vpop.eup %983  ;;  %895 = vst.msk [vmem:[%s1783_s4 + $0x48] sm:$0xff] %vm812_vm3, %v982_v57 }
 0x1cd   :  { %894 = vst.msk [vmem:[%s1783_s4 + $0x40] sm:$0x7] %vm815_vm4, %v984_v12 }
 0x1cf   :  { %v986_v9 = vpop.eup %985 }
 0x1d0   :  { %v988_v50 = vpop.eup %987  ;;  %897 = vst.msk [vmem:[%s1783_s4 + $0x58] sm:$0x7] %vm815_vm4, %v986_v9 }
 0x1d1   :  { %896 = vst.msk [vmem:[%s1783_s4 + $0x50] sm:$0xff] %vm812_vm3, %v988_v50 }
 0x1d2   :  { %906 = vsyncpa [#allocation4], 1 }
 0x1d3   :  { %907 = vsyncpa [#allocation5], 1 }
 0x1d4   :  { %908 = vsyncpa [#allocation7], 1 }

</bundles_post_ra>
